<compile_context>
chip_gen: v5e
topology: v5e:2x2
jax: 0.10.0
libtpu: 0.0.40
codegen_flags: <defaults>
</compile_context>

<pallas_src>
import math
from functools import partial

import jax
import jax.numpy as jnp
from jax.experimental import pallas as pl
from jax.experimental.pallas import tpu as pltpu


# --------------------------- in-kernel math helpers ---------------------------

def _mm(a, w):
    """MXU matmul: bf16 operands, f32 accumulation."""
    return jnp.dot(a.astype(jnp.bfloat16), w.astype(jnp.bfloat16),
                   preferred_element_type=jnp.float32)


def _layernorm(x, g, b, eps=1e-6):
    mu = jnp.mean(x, axis=-1, keepdims=True)
    xc = x - mu
    var = jnp.mean(xc * xc, axis=-1, keepdims=True)
    return xc * jax.lax.rsqrt(var + eps) * g + b


def _erf(z):
    # Abramowitz-Stegun 7.1.26 (|abs err| < 1.5e-7); built from abs/exp/where/poly,
    # all of which have guaranteed Mosaic lowerings.
    za = jnp.abs(z)
    t = 1.0 / (1.0 + 0.3275911 * za)
    poly = t * (0.254829592 + t * (-0.284496736 + t * (1.421413741
                + t * (-1.453152027 + t * 1.061405429))))
    y = 1.0 - poly * jnp.exp(-za * za)
    return jnp.where(z >= 0.0, y, -y)


def _gelu(x):
    # exact (erf-based) GELU, matching torch.nn.functional.gelu default
    return 0.5 * x * (1.0 + _erf(x * 0.7071067811865476))


# ------------------------------- fused kernel --------------------------------

def _encoder_kernel(xp_ref, pw_ref, pb_ref, pos_ref,
                    ln1g_ref, ln1b_ref, wqkv_ref, bqkv_ref, wo_ref, bo_ref,
                    ln2g_ref, ln2b_ref, w1_ref, b1_ref, w2_ref, b2_ref,
                    encg_ref, encb_ref,
                    o_ref, acc_ref,
                    *, num_heads, bb, seq, hidden):
    """Grid = (batch_tiles, L).  One step = one transformer Block on a (Bb*S, Hd) slab.

    Layer 0 additionally computes the patch-embedding matmul (+bias +pos-emb); the last
    layer additionally applies the final encoder LayerNorm and stores the output block.
    The residual stream stays resident in the f32 VMEM scratch `acc_ref` for all L steps.
    """
    l = pl.program_id(1)
    n_layers = pl.num_programs(1)
    mrows = bb * seq
    dh = hidden // num_heads
    scale = 1.0 / math.sqrt(dh)

    # ---- layer 0 only: patch-embedding matmul + bias + position embedding ----
    @pl.when(l == 0)
    def _():
        xp = xp_ref[...].reshape(mrows, -1)                      # (M, C*p*p)
        emb = _mm(xp, pw_ref[...]) + pb_ref[...]                 # (M, Hd)
        emb = emb.reshape(bb, seq, hidden) + pos_ref[...]        # + pos (broadcast over Bb)
        acc_ref[...] = emb.reshape(mrows, hidden)                # dropout = identity (eval)

    x = acc_ref[...]                                             # (M, Hd) f32 residual stream

    # --------------------------- attention sub-layer ---------------------------
    xn = _layernorm(x, ln1g_ref[0], ln1b_ref[0])
    qkv = _mm(xn, wqkv_ref[0]) + bqkv_ref[0]                     # fused Q|K|V, (M, 3*Hd)
    # hoist: fold 1/sqrt(dh) into Q and cast Q/K/V to bf16 once (not per head)
    q_all = (qkv[:, :hidden] * scale).astype(jnp.bfloat16)
    k_all = qkv[:, hidden:2 * hidden].astype(jnp.bfloat16)
    v_all = qkv[:, 2 * hidden:].astype(jnp.bfloat16)

    ctx_heads = []
    for h in range(num_heads):                                   # static unroll (few heads)
        sl = slice(h * dh, (h + 1) * dh)
        qh = q_all[:, sl].reshape(bb, seq, dh)                   # leading-dim split only
        kh = k_all[:, sl].reshape(bb, seq, dh)
        vh = v_all[:, sl].reshape(bb, seq, dh)
        s = jnp.einsum('bqd,bkd->bqk', qh, kh,
                       preferred_element_type=jnp.float32)       # (Bb, S, S)
        s = s - jnp.max(s, axis=-1, keepdims=True)
        e = jnp.exp(s)
        p = e * pl.reciprocal(jnp.sum(e, axis=-1, keepdims=True), approx=True)
        ctx = jnp.einsum('bqk,bkd->bqd', p.astype(jnp.bfloat16), vh,
                         preferred_element_type=jnp.float32)     # (Bb, S, dh)
        ctx_heads.append(ctx.reshape(mrows, dh))
    ctx = jnp.concatenate(ctx_heads, axis=-1)                    # (M, Hd)
    # ONE (M,Hd)@(Hd,Hd) output projection instead of num_heads K=dh matmuls
    x = x + _mm(ctx, wo_ref[0]) + bo_ref[0]

    # ------------------------------ MLP sub-layer ------------------------------
    xn = _layernorm(x, ln2g_ref[0], ln2b_ref[0])
    hmid = _gelu(_mm(xn, w1_ref[0]) + b1_ref[0])
    x = x + _mm(hmid, w2_ref[0]) + b2_ref[0]

    acc_ref[...] = x                                             # residual stays in VMEM

    # ---- last layer: fused final encoder LayerNorm + output store ----
    @pl.when(l == n_layers - 1)
    def _():
        y = _layernorm(x, encg_ref[...], encb_ref[...])
        o_ref[...] = y.reshape(bb, seq, hidden)


# --------------------------------- wrappers -----------------------------------

def _pick_batch_tile(batch, seq):
    """Smallest divisor of `batch` whose row count Bb*seq reaches ~256 (MXU-filling);
    falls back to the whole batch when the batch is small."""
    best = 1
    for d in range(1, batch + 1):
        if batch % d == 0:
            best = d
            if d * seq >= 256:
                break
    return best


def _vmem_limit_bytes(bb, seq, hd, mlp, cpp, nh):
    m = bb * seq
    weights = 2 * 2 * (hd * 3 * hd + hd * hd + 2 * hd * mlp)     # bf16, double-buffered layer weights
    weights += 2 * (cpp * hd + 2 * seq * hd)                     # resident embedding weights/pos
    acts = 4 * (m * (6 * hd + 3 * hd + mlp + cpp) + bb * nh * seq * seq + bb * seq * hd)
    est = weights + acts
    # explicit scoped-VMEM limit (review): generous, but capped so it is legal on v7x (64 MiB)
    return int(min(max(4 * est, 32 * 1024 * 1024), 56 * 1024 * 1024))


def transformer_forward(x, params, cfg):
    """Transformer.forward: returns (encoded, attn_weights, features)."""
    B, C, H, W = x.shape
    patch = cfg["patch"]
    Hd, mlp = cfg["hidden_size"], cfg["mlp_dim"]
    L, nh = cfg["num_layers"], cfg["num_heads"]
    hp, wp = H // patch, W // patch
    S = hp * wp
    Cpp = C * patch * patch

    # Non-overlapping patch extraction (kernel==stride) is a pure layout reshuffle -> XLA glue.
    xr = x.reshape(B, C, hp, patch, wp, patch)
    xr = jnp.transpose(xr, (0, 2, 4, 1, 3, 5)).reshape(B, S, Cpp)

    pw = params["patch_w"].reshape(Hd, Cpp).T.astype(jnp.bfloat16)   # torch Conv2d (Hd,C,p,p)
    pb = params["patch_b"].reshape(1, Hd)
    pos = params["pos_emb"].reshape(S, Hd)

    # Stack per-layer weights with a leading layer axis so the inner ("arbitrary") grid axis
    # streams layer l+1's weights while layer l computes.  Vectors are (L,1,dim) so the
    # block's last-two dims always equal the array's last-two dims.
    layers = params["layers"]

    def stack_mat(name):
        return jnp.stack([lp[name] for lp in layers], axis=0).astype(jnp.bfloat16)

    def stack_vec(name, dim):
        return jnp.stack([lp[name].reshape(1, dim) for lp in layers], axis=0)

    ln1g, ln1b = stack_vec("ln1_g", Hd), stack_vec("ln1_b", Hd)
    wqkv, bqkv = stack_mat("wqkv"), stack_vec("bqkv", 3 * Hd)
    wo, bo = stack_mat("wo"), stack_vec("bo", Hd)
    ln2g, ln2b = stack_vec("ln2_g", Hd), stack_vec("ln2_b", Hd)
    w1, b1 = stack_mat("w1"), stack_vec("b1", mlp)
    w2, b2 = stack_mat("w2"), stack_vec("b2", Hd)
    encg = params["enc_ln_g"].reshape(1, Hd)
    encb = params["enc_ln_b"].reshape(1, Hd)

    Bb = _pick_batch_tile(B, S)
    nb = B // Bb

    encoded = pl.pallas_call(
        partial(_encoder_kernel, num_heads=nh, bb=Bb, seq=S, hidden=Hd),
        out_shape=jax.ShapeDtypeStruct((B, S, Hd), jnp.float32),
        grid_spec=pltpu.PrefetchScalarGridSpec(
            num_scalar_prefetch=0,
            grid=(nb, L),
            in_specs=[
                pl.BlockSpec((Bb, S, Cpp), lambda b, l: (b, 0, 0)),       # patches
                pl.BlockSpec((Cpp, Hd), lambda b, l: (0, 0)),             # patch W (bf16)
                pl.BlockSpec((1, Hd), lambda b, l: (0, 0)),               # patch bias
                pl.BlockSpec((S, Hd), lambda b, l: (0, 0)),               # position emb
                pl.BlockSpec((1, 1, Hd), lambda b, l: (l, 0, 0)),         # ln1 gamma
                pl.BlockSpec((1, 1, Hd), lambda b, l: (l, 0, 0)),         # ln1 beta
                pl.BlockSpec((1, Hd, 3 * Hd), lambda b, l: (l, 0, 0)),    # fused Wqkv (bf16)
                pl.BlockSpec((1, 1, 3 * Hd), lambda b, l: (l, 0, 0)),     # fused bqkv
                pl.BlockSpec((1, Hd, Hd), lambda b, l: (l, 0, 0)),        # Wo (bf16)
                pl.BlockSpec((1, 1, Hd), lambda b, l: (l, 0, 0)),         # bo
                pl.BlockSpec((1, 1, Hd), lambda b, l: (l, 0, 0)),         # ln2 gamma
                pl.BlockSpec((1, 1, Hd), lambda b, l: (l, 0, 0)),         # ln2 beta
                pl.BlockSpec((1, Hd, mlp), lambda b, l: (l, 0, 0)),       # W1 (bf16)
                pl.BlockSpec((1, 1, mlp), lambda b, l: (l, 0, 0)),        # b1
                pl.BlockSpec((1, mlp, Hd), lambda b, l: (l, 0, 0)),       # W2 (bf16)
                pl.BlockSpec((1, 1, Hd), lambda b, l: (l, 0, 0)),         # b2
                pl.BlockSpec((1, Hd), lambda b, l: (0, 0)),               # encoder-norm gamma
                pl.BlockSpec((1, Hd), lambda b, l: (0, 0)),               # encoder-norm beta
            ],
            out_specs=pl.BlockSpec((Bb, S, Hd), lambda b, l: (b, 0, 0)),  # resident across l
            scratch_shapes=[pltpu.VMEM((Bb * S, Hd), jnp.float32)],       # residual stream
        ),
        compiler_params=pltpu.CompilerParams(
            dimension_semantics=("parallel", "arbitrary"),
            vmem_limit_bytes=_vmem_limit_bytes(Bb, S, Hd, mlp, Cpp, nh)),
    )(xr, pw, pb, pos, ln1g, ln1b, wqkv, bqkv, wo, bo, ln2g, ln2b, w1, b1, w2, b2, encg, encb)

    return encoded, [], None                                     # vis=False, non-hybrid


# ------------------------------ parameter init --------------------------------

def make_params(key, cfg):
    Hd, mlp, L = cfg["hidden_size"], cfg["mlp_dim"], cfg["num_layers"]
    patch = cfg["patch"]
    n_patches = (cfg["img_size"] // patch) ** 2
    ki = iter(jax.random.split(key, 8 + 16 * L))

    def nrm(shape, s=0.05):
        return (s * jax.random.normal(next(ki), shape)).astype(jnp.float32)

    params = {
        # torch Conv2d weight layout (Hd, C, p, p); wrapper consumes .reshape(Hd,-1).T
        "patch_w": nrm((Hd, 3, patch, patch)),
        "patch_b": nrm((Hd,)),
        # torch initializes position embeddings to zeros; random here for a nontrivial test
        "pos_emb": nrm((1, n_patches, Hd)),
        "enc_ln_g": jnp.ones((Hd,), jnp.float32),
        "enc_ln_b": jnp.zeros((Hd,), jnp.float32),
    }
    layers = []
    for _ in range(L):
        layers.append({
            "ln1_g": jnp.ones((Hd,), jnp.float32), "ln1_b": jnp.zeros((Hd,), jnp.float32),
            # (in, out) layout == torch Linear weight.T; Q/K/V fused along the output axis
            "wqkv": nrm((Hd, 3 * Hd)), "bqkv": nrm((3 * Hd,)),
            "wo": nrm((Hd, Hd)), "bo": nrm((Hd,)),
            "ln2_g": jnp.ones((Hd,), jnp.float32), "ln2_b": jnp.zeros((Hd,), jnp.float32),
            "w1": nrm((Hd, mlp)), "b1": nrm((mlp,), 1e-6),
            "w2": nrm((mlp, Hd)), "b2": nrm((Hd,), 1e-6),
        })
    params["layers"] = layers
    return params


# ----------------------------- pure-JAX reference ------------------------------

def _reference_forward(x, params, cfg):
    """f32 reference of the torch module (exact softmax / erf GELU) for tolerance testing."""
    B, C, H, W = x.shape
    p, Hd, nh = cfg["patch"], cfg["hidden_size"], cfg["num_heads"]
    hp, wp = H // p, W // p
    S, Cpp = hp * wp, C * p * p
    dh = Hd // nh
    xr = x.reshape(B, C, hp, p, wp, p).transpose(0, 2, 4, 1, 3, 5).reshape(B, S, Cpp)
    h = xr @ params["patch_w"].reshape(Hd, Cpp).T + params["patch_b"] + params["pos_emb"]

    def ln(z, g, b):
        mu = z.mean(-1, keepdims=True)
        v = ((z - mu) ** 2).mean(-1, keepdims=True)
        return (z - mu) * jax.lax.rsqrt(v + 1e-6) * g + b

    def split(t):
        return t.reshape(B, S, nh, dh).transpose(0, 2, 1, 3)

    for lp in params["layers"]:
        xn = ln(h, lp["ln1_g"], lp["ln1_b"])
        qkv = xn @ lp["wqkv"] + lp["bqkv"]
        q, k, v = split(qkv[..., :Hd]), split(qkv[..., Hd:2 * Hd]), split(qkv[..., 2 * Hd:])
        s = jnp.einsum('bhqd,bhkd->bhqk', q, k) / math.sqrt(dh)
        a = jax.nn.softmax(s, axis=-1)
        ctx = jnp.einsum('bhqk,bhkd->bhqd', a, v).transpose(0, 2, 1, 3).reshape(B, S, Hd)
        h = h + ctx @ lp["wo"] + lp["bo"]
        xn = ln(h, lp["ln2_g"], lp["ln2_b"])
        mid = jax.nn.gelu(xn @ lp["w1"] + lp["b1"], approximate=False)
        h = h + mid @ lp["w2"] + lp["b2"]
    return ln(h, params["enc_ln_g"], params["enc_ln_b"])


# ----------------------------------- main --------------------------------------

if __name__ == "__main__":
    cfg = dict(
        hidden_size=32,
        num_heads=4,
        mlp_dim=64,
        num_layers=2,
        patch=4,                    # config.patches['size'] = (4, 4), non-hybrid
        img_size=16,
    )
    key = jax.random.PRNGKey(0)
    kx, kp = jax.random.split(key)
    x = jax.random.normal(kx, (2, 3, cfg["img_size"], cfg["img_size"]), dtype=jnp.float32)
    params = make_params(kp, cfg)

    fwd = jax.jit(lambda xx, pp: transformer_forward(xx, pp, cfg))
    encoded, attn_weights, features = fwd(x, params)
    encoded = jax.block_until_ready(encoded)

    S = (cfg["img_size"] // cfg["patch"]) ** 2                   # 16 patches
    assert encoded.shape == (2, S, cfg["hidden_size"]), encoded.shape
    assert bool(jnp.all(jnp.isfinite(encoded)))
    assert attn_weights == [] and features is None

    # tolerance test vs. an exact f32 reference (bf16 weights + approx softmax recip in kernel)
    ref = _reference_forward(x, params, cfg)
    err = float(jnp.max(jnp.abs(encoded - ref)))
    assert err < 0.2, f"max abs error vs f32 reference too large: {err}"
    print("KERNEL_OK")
</pallas_src>

<mosaic_0001>
module attributes {stable_mosaic.version = 11 : i64} {
  func.func @_encoder_kernel(%arg0: i32, %arg1: i32, %arg2: memref<2x16x48xf32, #tpu.memory_space<vmem>>, %arg3: memref<48x32xbf16, #tpu.memory_space<vmem>>, %arg4: memref<1x32xf32, #tpu.memory_space<vmem>>, %arg5: memref<16x32xf32, #tpu.memory_space<vmem>>, %arg6: memref<1x1x32xf32, #tpu.memory_space<vmem>>, %arg7: memref<1x1x32xf32, #tpu.memory_space<vmem>>, %arg8: memref<1x32x96xbf16, #tpu.memory_space<vmem>>, %arg9: memref<1x1x96xf32, #tpu.memory_space<vmem>>, %arg10: memref<1x32x32xbf16, #tpu.memory_space<vmem>>, %arg11: memref<1x1x32xf32, #tpu.memory_space<vmem>>, %arg12: memref<1x1x32xf32, #tpu.memory_space<vmem>>, %arg13: memref<1x1x32xf32, #tpu.memory_space<vmem>>, %arg14: memref<1x32x64xbf16, #tpu.memory_space<vmem>>, %arg15: memref<1x1x64xf32, #tpu.memory_space<vmem>>, %arg16: memref<1x64x32xbf16, #tpu.memory_space<vmem>>, %arg17: memref<1x1x32xf32, #tpu.memory_space<vmem>>, %arg18: memref<1x32xf32, #tpu.memory_space<vmem>>, %arg19: memref<1x32xf32, #tpu.memory_space<vmem>>, %arg20: memref<2x16x32xf32, #tpu.memory_space<vmem>>, %arg21: memref<32x32xf32, #tpu.memory_space<vmem>>) attributes {dimension_semantics = [#tpu.dimension_semantics<parallel>, #tpu.dimension_semantics<arbitrary>], iteration_bounds = array<i64: 1, 2>, scalar_prefetch = 0 : i64, scratch_operands = 1 : i64, tpu.core_type = #tpu.core_type<tc>, window_params = [{transform_indices = @transform_0, window_bounds = array<i64: 2, 16, 48>}, {pipeline_mode = #tpu.pipeline_mode<synchronous>, transform_indices = @transform_1, window_bounds = array<i64: 48, 32>}, {pipeline_mode = #tpu.pipeline_mode<synchronous>, transform_indices = @transform_2, window_bounds = array<i64: 1, 32>}, {pipeline_mode = #tpu.pipeline_mode<synchronous>, transform_indices = @transform_3, window_bounds = array<i64: 16, 32>}, {transform_indices = @transform_4, window_bounds = array<i64: 1, 1, 32>}, {transform_indices = @transform_5, window_bounds = array<i64: 1, 1, 32>}, {transform_indices = @transform_6, window_bounds = array<i64: 1, 32, 96>}, {transform_indices = @transform_7, window_bounds = array<i64: 1, 1, 96>}, {transform_indices = @transform_8, window_bounds = array<i64: 1, 32, 32>}, {transform_indices = @transform_9, window_bounds = array<i64: 1, 1, 32>}, {transform_indices = @transform_10, window_bounds = array<i64: 1, 1, 32>}, {transform_indices = @transform_11, window_bounds = array<i64: 1, 1, 32>}, {transform_indices = @transform_12, window_bounds = array<i64: 1, 32, 64>}, {transform_indices = @transform_13, window_bounds = array<i64: 1, 1, 64>}, {transform_indices = @transform_14, window_bounds = array<i64: 1, 64, 32>}, {transform_indices = @transform_15, window_bounds = array<i64: 1, 1, 32>}, {pipeline_mode = #tpu.pipeline_mode<synchronous>, transform_indices = @transform_16, window_bounds = array<i64: 1, 32>}, {pipeline_mode = #tpu.pipeline_mode<synchronous>, transform_indices = @transform_17, window_bounds = array<i64: 1, 32>}, {transform_indices = @transform_18, window_bounds = array<i64: 2, 16, 32>}]} {
    %c0_i32 = arith.constant 0 : i32
    %0 = arith.cmpi eq, %arg1, %c0_i32 : i32
    %1 = arith.extui %0 : i1 to i32
    %c0_i32_0 = arith.constant 0 : i32
    %2 = arith.cmpi ne, %1, %c0_i32_0 : i32
    scf.if %2 {
      %c0_86 = arith.constant 0 : index
      %c0_87 = arith.constant 0 : index
      %c0_88 = arith.constant 0 : index
      %219 = vector.load %arg2[%c0_86, %c0_87, %c0_88] : memref<2x16x48xf32, #tpu.memory_space<vmem>>, vector<2x16x48xf32>
      %220 = vector.shape_cast %219 : vector<2x16x48xf32> to vector<32x48xf32>
      %c0_89 = arith.constant 0 : index
      %c0_90 = arith.constant 0 : index
      %221 = vector.load %arg3[%c0_89, %c0_90] : memref<48x32xbf16, #tpu.memory_space<vmem>>, vector<48x32xbf16>
      %222 = arith.truncf %220 : vector<32x48xf32> to vector<32x48xbf16>
      %cst_91 = arith.constant dense<0.000000e+00> : vector<32x32xf32>
      %223 = tpu.matmul %222, %221, %cst_91 {dimension_numbers = #tpu.dot_dimension_numbers<[1], [0], [0], [1], [0, 0, 1, 1], [], []>} : vector<32x48xbf16>, vector<48x32xbf16>, vector<32x32xf32> -> vector<32x32xf32>
      %c0_92 = arith.constant 0 : index
      %c0_93 = arith.constant 0 : index
      %224 = vector.load %arg4[%c0_92, %c0_93] : memref<1x32xf32, #tpu.memory_space<vmem>>, vector<1x32xf32>
      %225 = vector.broadcast %224 : vector<1x32xf32> to vector<32x32xf32>
      %226 = arith.addf %223, %225 : vector<32x32xf32>
      %227 = vector.shape_cast %226 : vector<32x32xf32> to vector<2x16x32xf32>
      %c0_94 = arith.constant 0 : index
      %c0_95 = arith.constant 0 : index
      %228 = vector.load %arg5[%c0_94, %c0_95] : memref<16x32xf32, #tpu.memory_space<vmem>>, vector<16x32xf32>
      %229 = vector.shape_cast %228 : vector<16x32xf32> to vector<1x16x32xf32>
      %230 = vector.broadcast %229 : vector<1x16x32xf32> to vector<2x16x32xf32>
      %231 = arith.addf %227, %230 : vector<2x16x32xf32>
      %232 = vector.shape_cast %231 : vector<2x16x32xf32> to vector<32x32xf32>
      %c0_96 = arith.constant 0 : index
      %c0_97 = arith.constant 0 : index
      %233 = vector.load %arg21[%c0_96, %c0_97] : memref<32x32xf32, #tpu.memory_space<vmem>>, vector<32x32xf32>
      tpu.vector_store %arg21[%c0_96, %c0_97], %232 {strides = array<i32>} : memref<32x32xf32, #tpu.memory_space<vmem>>, vector<32x32xf32>,
    } else {
    }
    %c0 = arith.constant 0 : index
    %c0_1 = arith.constant 0 : index
    %3 = vector.load %arg21[%c0, %c0_1] : memref<32x32xf32, #tpu.memory_space<vmem>>, vector<32x32xf32>
    %c0_2 = arith.constant 0 : index
    %c0_3 = arith.constant 0 : index
    %c0_4 = arith.constant 0 : index
    %4 = vector.load %arg6[%c0_2, %c0_3, %c0_4] : memref<1x1x32xf32, #tpu.memory_space<vmem>>, vector<1x1x32xf32>
    %5 = vector.shape_cast %4 : vector<1x1x32xf32> to vector<1x32xf32>
    %c0_5 = arith.constant 0 : index
    %c0_6 = arith.constant 0 : index
    %c0_7 = arith.constant 0 : index
    %6 = vector.load %arg7[%c0_5, %c0_6, %c0_7] : memref<1x1x32xf32, #tpu.memory_space<vmem>>, vector<1x1x32xf32>
    %7 = vector.shape_cast %6 : vector<1x1x32xf32> to vector<1x32xf32>
    %cst = arith.constant dense<0.000000e+00> : vector<32xf32>
    %8 = vector.multi_reduction <add>, %3, %cst [1] : vector<32x32xf32> to vector<32xf32>
    %9 = vector.shape_cast %8 : vector<32xf32> to vector<32x1xf32>
    %cst_8 = arith.constant 3.200000e+01 : f32
    %10 = vector.broadcast %cst_8 : f32 to vector<32x1xf32>
    %11 = arith.divf %9, %10 : vector<32x1xf32>
    %12 = vector.broadcast %11 : vector<32x1xf32> to vector<32x32xf32>
    %13 = arith.subf %3, %12 : vector<32x32xf32>
    %14 = arith.mulf %13, %13 : vector<32x32xf32>
    %cst_9 = arith.constant dense<0.000000e+00> : vector<32xf32>
    %15 = vector.multi_reduction <add>, %14, %cst_9 [1] : vector<32x32xf32> to vector<32xf32>
    %16 = vector.shape_cast %15 : vector<32xf32> to vector<32x1xf32>
    %cst_10 = arith.constant 3.200000e+01 : f32
    %17 = vector.broadcast %cst_10 : f32 to vector<32x1xf32>
    %18 = arith.divf %16, %17 : vector<32x1xf32>
    %cst_11 = arith.constant 9.99999997E-7 : f32
    %19 = vector.broadcast %cst_11 : f32 to vector<32x1xf32>
    %20 = arith.addf %18, %19 : vector<32x1xf32>
    %21 = math.rsqrt %20 : vector<32x1xf32>
    %22 = vector.broadcast %21 : vector<32x1xf32> to vector<32x32xf32>
    %23 = arith.mulf %13, %22 : vector<32x32xf32>
    %24 = vector.broadcast %5 : vector<1x32xf32> to vector<32x32xf32>
    %25 = arith.mulf %23, %24 : vector<32x32xf32>
    %26 = vector.broadcast %7 : vector<1x32xf32> to vector<32x32xf32>
    %27 = arith.addf %25, %26 : vector<32x32xf32>
    %c0_12 = arith.constant 0 : index
    %c0_13 = arith.constant 0 : index
    %c0_14 = arith.constant 0 : index
    %28 = vector.load %arg8[%c0_12, %c0_13, %c0_14] : memref<1x32x96xbf16, #tpu.memory_space<vmem>>, vector<1x32x96xbf16>
    %29 = vector.shape_cast %28 : vector<1x32x96xbf16> to vector<32x96xbf16>
    %30 = arith.truncf %27 : vector<32x32xf32> to vector<32x32xbf16>
    %cst_15 = arith.constant dense<0.000000e+00> : vector<32x96xf32>
    %31 = tpu.matmul %30, %29, %cst_15 {dimension_numbers = #tpu.dot_dimension_numbers<[1], [0], [0], [1], [0, 0, 1, 1], [], []>} : vector<32x32xbf16>, vector<32x96xbf16>, vector<32x96xf32> -> vector<32x96xf32>
    %c0_16 = arith.constant 0 : index
    %c0_17 = arith.constant 0 : index
    %c0_18 = arith.constant 0 : index
    %32 = vector.load %arg9[%c0_16, %c0_17, %c0_18] : memref<1x1x96xf32, #tpu.memory_space<vmem>>, vector<1x1x96xf32>
    %33 = vector.shape_cast %32 : vector<1x1x96xf32> to vector<1x96xf32>
    %34 = vector.broadcast %33 : vector<1x96xf32> to vector<32x96xf32>
    %35 = arith.addf %31, %34 : vector<32x96xf32>
    %36 = vector.extract_strided_slice %35 {offsets = [0, 0], sizes = [32, 32], strides = [1, 1]} : vector<32x96xf32> to vector<32x32xf32>
    %cst_19 = arith.constant 0.353553385 : f32
    %37 = vector.broadcast %cst_19 : f32 to vector<32x32xf32>
    %38 = arith.mulf %36, %37 : vector<32x32xf32>
    %39 = arith.truncf %38 : vector<32x32xf32> to vector<32x32xbf16>
    %40 = vector.extract_strided_slice %35 {offsets = [0, 32], sizes = [32, 32], strides = [1, 1]} : vector<32x96xf32> to vector<32x32xf32>
    %41 = arith.truncf %40 : vector<32x32xf32> to vector<32x32xbf16>
    %42 = vector.extract_strided_slice %35 {offsets = [0, 64], sizes = [32, 32], strides = [1, 1]} : vector<32x96xf32> to vector<32x32xf32>
    %43 = arith.truncf %42 : vector<32x32xf32> to vector<32x32xbf16>
    %44 = vector.extract_strided_slice %39 {offsets = [0, 0], sizes = [32, 8], strides = [1, 1]} : vector<32x32xbf16> to vector<32x8xbf16>
    %45 = vector.shape_cast %44 : vector<32x8xbf16> to vector<2x16x8xbf16>
    %46 = vector.extract_strided_slice %41 {offsets = [0, 0], sizes = [32, 8], strides = [1, 1]} : vector<32x32xbf16> to vector<32x8xbf16>
    %47 = vector.shape_cast %46 : vector<32x8xbf16> to vector<2x16x8xbf16>
    %48 = vector.extract_strided_slice %43 {offsets = [0, 0], sizes = [32, 8], strides = [1, 1]} : vector<32x32xbf16> to vector<32x8xbf16>
    %49 = vector.shape_cast %48 : vector<32x8xbf16> to vector<2x16x8xbf16>
    "tpu.trace_start"() <{level = 10 : i32, message = "bqd,bkd->bqk"}> : () -> ()
    %cst_20 = arith.constant dense<0.000000e+00> : vector<2x16x16xf32>
    %50 = tpu.matmul %45, %47, %cst_20 {dimension_numbers = #tpu.dot_dimension_numbers<[2], [2], [1], [1], [0, 0, 0, 1, 1, 1], [0], [0]>} : vector<2x16x8xbf16>, vector<2x16x8xbf16>, vector<2x16x16xf32> -> vector<2x16x16xf32>
    "tpu.trace_stop"() : () -> ()
    %cst_21 = arith.constant dense<0xFF800000> : vector<2x16xf32>
    %51 = vector.multi_reduction <maximumf>, %50, %cst_21 [2] : vector<2x16x16xf32> to vector<2x16xf32>
    %52 = vector.shape_cast %51 : vector<2x16xf32> to vector<2x16x1xf32>
    %53 = vector.broadcast %52 : vector<2x16x1xf32> to vector<2x16x16xf32>
    %54 = arith.subf %50, %53 : vector<2x16x16xf32>
    %55 = math.exp %54 : vector<2x16x16xf32>
    %cst_22 = arith.constant dense<0.000000e+00> : vector<2x16xf32>
    %56 = vector.multi_reduction <add>, %55, %cst_22 [2] : vector<2x16x16xf32> to vector<2x16xf32>
    %57 = vector.shape_cast %56 : vector<2x16xf32> to vector<2x16x1xf32>
    %58 = tpu.reciprocal %57 {approx = true} : vector<2x16x1xf32> -> vector<2x16x1xf32>
    %59 = vector.broadcast %58 : vector<2x16x1xf32> to vector<2x16x16xf32>
    %60 = arith.mulf %55, %59 : vector<2x16x16xf32>
    %61 = arith.truncf %60 : vector<2x16x16xf32> to vector<2x16x16xbf16>
    "tpu.trace_start"() <{level = 10 : i32, message = "bqk,bkd->bqd"}> : () -> ()
    %cst_23 = arith.constant dense<0.000000e+00> : vector<2x16x8xf32>
    %62 = tpu.matmul %61, %49, %cst_23 {dimension_numbers = #tpu.dot_dimension_numbers<[2], [1], [1], [2], [0, 0, 0, 1, 1, 2], [0], [0]>} : vector<2x16x16xbf16>, vector<2x16x8xbf16>, vector<2x16x8xf32> -> vector<2x16x8xf32>
    "tpu.trace_stop"() : () -> ()
    %63 = vector.shape_cast %62 : vector<2x16x8xf32> to vector<32x8xf32>
    %64 = vector.extract_strided_slice %39 {offsets = [0, 8], sizes = [32, 8], strides = [1, 1]} : vector<32x32xbf16> to vector<32x8xbf16>
    %65 = vector.shape_cast %64 : vector<32x8xbf16> to vector<2x16x8xbf16>
    %66 = vector.extract_strided_slice %41 {offsets = [0, 8], sizes = [32, 8], strides = [1, 1]} : vector<32x32xbf16> to vector<32x8xbf16>
    %67 = vector.shape_cast %66 : vector<32x8xbf16> to vector<2x16x8xbf16>
    %68 = vector.extract_strided_slice %43 {offsets = [0, 8], sizes = [32, 8], strides = [1, 1]} : vector<32x32xbf16> to vector<32x8xbf16>
    %69 = vector.shape_cast %68 : vector<32x8xbf16> to vector<2x16x8xbf16>
    "tpu.trace_start"() <{level = 10 : i32, message = "bqd,bkd->bqk"}> : () -> ()
    %cst_24 = arith.constant dense<0.000000e+00> : vector<2x16x16xf32>
    %70 = tpu.matmul %65, %67, %cst_24 {dimension_numbers = #tpu.dot_dimension_numbers<[2], [2], [1], [1], [0, 0, 0, 1, 1, 1], [0], [0]>} : vector<2x16x8xbf16>, vector<2x16x8xbf16>, vector<2x16x16xf32> -> vector<2x16x16xf32>
    "tpu.trace_stop"() : () -> ()
    %cst_25 = arith.constant dense<0xFF800000> : vector<2x16xf32>
    %71 = vector.multi_reduction <maximumf>, %70, %cst_25 [2] : vector<2x16x16xf32> to vector<2x16xf32>
    %72 = vector.shape_cast %71 : vector<2x16xf32> to vector<2x16x1xf32>
    %73 = vector.broadcast %72 : vector<2x16x1xf32> to vector<2x16x16xf32>
    %74 = arith.subf %70, %73 : vector<2x16x16xf32>
    %75 = math.exp %74 : vector<2x16x16xf32>
    %cst_26 = arith.constant dense<0.000000e+00> : vector<2x16xf32>
    %76 = vector.multi_reduction <add>, %75, %cst_26 [2] : vector<2x16x16xf32> to vector<2x16xf32>
    %77 = vector.shape_cast %76 : vector<2x16xf32> to vector<2x16x1xf32>
    %78 = tpu.reciprocal %77 {approx = true} : vector<2x16x1xf32> -> vector<2x16x1xf32>
    %79 = vector.broadcast %78 : vector<2x16x1xf32> to vector<2x16x16xf32>
    %80 = arith.mulf %75, %79 : vector<2x16x16xf32>
    %81 = arith.truncf %80 : vector<2x16x16xf32> to vector<2x16x16xbf16>
    "tpu.trace_start"() <{level = 10 : i32, message = "bqk,bkd->bqd"}> : () -> ()
    %cst_27 = arith.constant dense<0.000000e+00> : vector<2x16x8xf32>
    %82 = tpu.matmul %81, %69, %cst_27 {dimension_numbers = #tpu.dot_dimension_numbers<[2], [1], [1], [2], [0, 0, 0, 1, 1, 2], [0], [0]>} : vector<2x16x16xbf16>, vector<2x16x8xbf16>, vector<2x16x8xf32> -> vector<2x16x8xf32>
    "tpu.trace_stop"() : () -> ()
    %83 = vector.shape_cast %82 : vector<2x16x8xf32> to vector<32x8xf32>
    %84 = vector.extract_strided_slice %39 {offsets = [0, 16], sizes = [32, 8], strides = [1, 1]} : vector<32x32xbf16> to vector<32x8xbf16>
    %85 = vector.shape_cast %84 : vector<32x8xbf16> to vector<2x16x8xbf16>
    %86 = vector.extract_strided_slice %41 {offsets = [0, 16], sizes = [32, 8], strides = [1, 1]} : vector<32x32xbf16> to vector<32x8xbf16>
    %87 = vector.shape_cast %86 : vector<32x8xbf16> to vector<2x16x8xbf16>
    %88 = vector.extract_strided_slice %43 {offsets = [0, 16], sizes = [32, 8], strides = [1, 1]} : vector<32x32xbf16> to vector<32x8xbf16>
    %89 = vector.shape_cast %88 : vector<32x8xbf16> to vector<2x16x8xbf16>
    "tpu.trace_start"() <{level = 10 : i32, message = "bqd,bkd->bqk"}> : () -> ()
    %cst_28 = arith.constant dense<0.000000e+00> : vector<2x16x16xf32>
    %90 = tpu.matmul %85, %87, %cst_28 {dimension_numbers = #tpu.dot_dimension_numbers<[2], [2], [1], [1], [0, 0, 0, 1, 1, 1], [0], [0]>} : vector<2x16x8xbf16>, vector<2x16x8xbf16>, vector<2x16x16xf32> -> vector<2x16x16xf32>
    "tpu.trace_stop"() : () -> ()
    %cst_29 = arith.constant dense<0xFF800000> : vector<2x16xf32>
    %91 = vector.multi_reduction <maximumf>, %90, %cst_29 [2] : vector<2x16x16xf32> to vector<2x16xf32>
    %92 = vector.shape_cast %91 : vector<2x16xf32> to vector<2x16x1xf32>
    %93 = vector.broadcast %92 : vector<2x16x1xf32> to vector<2x16x16xf32>
    %94 = arith.subf %90, %93 : vector<2x16x16xf32>
    %95 = math.exp %94 : vector<2x16x16xf32>
    %cst_30 = arith.constant dense<0.000000e+00> : vector<2x16xf32>
    %96 = vector.multi_reduction <add>, %95, %cst_30 [2] : vector<2x16x16xf32> to vector<2x16xf32>
    %97 = vector.shape_cast %96 : vector<2x16xf32> to vector<2x16x1xf32>
    %98 = tpu.reciprocal %97 {approx = true} : vector<2x16x1xf32> -> vector<2x16x1xf32>
    %99 = vector.broadcast %98 : vector<2x16x1xf32> to vector<2x16x16xf32>
    %100 = arith.mulf %95, %99 : vector<2x16x16xf32>
    %101 = arith.truncf %100 : vector<2x16x16xf32> to vector<2x16x16xbf16>
    "tpu.trace_start"() <{level = 10 : i32, message = "bqk,bkd->bqd"}> : () -> ()
    %cst_31 = arith.constant dense<0.000000e+00> : vector<2x16x8xf32>
    %102 = tpu.matmul %101, %89, %cst_31 {dimension_numbers = #tpu.dot_dimension_numbers<[2], [1], [1], [2], [0, 0, 0, 1, 1, 2], [0], [0]>} : vector<2x16x16xbf16>, vector<2x16x8xbf16>, vector<2x16x8xf32> -> vector<2x16x8xf32>
    "tpu.trace_stop"() : () -> ()
    %103 = vector.shape_cast %102 : vector<2x16x8xf32> to vector<32x8xf32>
    %104 = vector.extract_strided_slice %39 {offsets = [0, 24], sizes = [32, 8], strides = [1, 1]} : vector<32x32xbf16> to vector<32x8xbf16>
    %105 = vector.shape_cast %104 : vector<32x8xbf16> to vector<2x16x8xbf16>
    %106 = vector.extract_strided_slice %41 {offsets = [0, 24], sizes = [32, 8], strides = [1, 1]} : vector<32x32xbf16> to vector<32x8xbf16>
    %107 = vector.shape_cast %106 : vector<32x8xbf16> to vector<2x16x8xbf16>
    %108 = vector.extract_strided_slice %43 {offsets = [0, 24], sizes = [32, 8], strides = [1, 1]} : vector<32x32xbf16> to vector<32x8xbf16>
    %109 = vector.shape_cast %108 : vector<32x8xbf16> to vector<2x16x8xbf16>
    "tpu.trace_start"() <{level = 10 : i32, message = "bqd,bkd->bqk"}> : () -> ()
    %cst_32 = arith.constant dense<0.000000e+00> : vector<2x16x16xf32>
    %110 = tpu.matmul %105, %107, %cst_32 {dimension_numbers = #tpu.dot_dimension_numbers<[2], [2], [1], [1], [0, 0, 0, 1, 1, 1], [0], [0]>} : vector<2x16x8xbf16>, vector<2x16x8xbf16>, vector<2x16x16xf32> -> vector<2x16x16xf32>
    "tpu.trace_stop"() : () -> ()
    %cst_33 = arith.constant dense<0xFF800000> : vector<2x16xf32>
    %111 = vector.multi_reduction <maximumf>, %110, %cst_33 [2] : vector<2x16x16xf32> to vector<2x16xf32>
    %112 = vector.shape_cast %111 : vector<2x16xf32> to vector<2x16x1xf32>
    %113 = vector.broadcast %112 : vector<2x16x1xf32> to vector<2x16x16xf32>
    %114 = arith.subf %110, %113 : vector<2x16x16xf32>
    %115 = math.exp %114 : vector<2x16x16xf32>
    %cst_34 = arith.constant dense<0.000000e+00> : vector<2x16xf32>
    %116 = vector.multi_reduction <add>, %115, %cst_34 [2] : vector<2x16x16xf32> to vector<2x16xf32>
    %117 = vector.shape_cast %116 : vector<2x16xf32> to vector<2x16x1xf32>
    %118 = tpu.reciprocal %117 {approx = true} : vector<2x16x1xf32> -> vector<2x16x1xf32>
    %119 = vector.broadcast %118 : vector<2x16x1xf32> to vector<2x16x16xf32>
    %120 = arith.mulf %115, %119 : vector<2x16x16xf32>
    %121 = arith.truncf %120 : vector<2x16x16xf32> to vector<2x16x16xbf16>
    "tpu.trace_start"() <{level = 10 : i32, message = "bqk,bkd->bqd"}> : () -> ()
    %cst_35 = arith.constant dense<0.000000e+00> : vector<2x16x8xf32>
    %122 = tpu.matmul %121, %109, %cst_35 {dimension_numbers = #tpu.dot_dimension_numbers<[2], [1], [1], [2], [0, 0, 0, 1, 1, 2], [0], [0]>} : vector<2x16x16xbf16>, vector<2x16x8xbf16>, vector<2x16x8xf32> -> vector<2x16x8xf32>
    "tpu.trace_stop"() : () -> ()
    %123 = vector.shape_cast %122 : vector<2x16x8xf32> to vector<32x8xf32>
    %124 = tpu.concatenate %63, %83, %103, %123 in 1 : vector<32x8xf32>, vector<32x8xf32>, vector<32x8xf32>, vector<32x8xf32> -> vector<32x32xf32>
    %c0_36 = arith.constant 0 : index
    %c0_37 = arith.constant 0 : index
    %c0_38 = arith.constant 0 : index
    %125 = vector.load %arg10[%c0_36, %c0_37, %c0_38] : memref<1x32x32xbf16, #tpu.memory_space<vmem>>, vector<1x32x32xbf16>
    %126 = vector.shape_cast %125 : vector<1x32x32xbf16> to vector<32x32xbf16>
    %127 = arith.truncf %124 : vector<32x32xf32> to vector<32x32xbf16>
    %cst_39 = arith.constant dense<0.000000e+00> : vector<32x32xf32>
    %128 = tpu.matmul %127, %126, %cst_39 {dimension_numbers = #tpu.dot_dimension_numbers<[1], [0], [0], [1], [0, 0, 1, 1], [], []>} : vector<32x32xbf16>, vector<32x32xbf16>, vector<32x32xf32> -> vector<32x32xf32>
    %129 = arith.addf %3, %128 : vector<32x32xf32>
    %c0_40 = arith.constant 0 : index
    %c0_41 = arith.constant 0 : index
    %c0_42 = arith.constant 0 : index
    %130 = vector.load %arg11[%c0_40, %c0_41, %c0_42] : memref<1x1x32xf32, #tpu.memory_space<vmem>>, vector<1x1x32xf32>
    %131 = vector.shape_cast %130 : vector<1x1x32xf32> to vector<1x32xf32>
    %132 = vector.broadcast %131 : vector<1x32xf32> to vector<32x32xf32>
    %133 = arith.addf %129, %132 : vector<32x32xf32>
    %c0_43 = arith.constant 0 : index
    %c0_44 = arith.constant 0 : index
    %c0_45 = arith.constant 0 : index
    %134 = vector.load %arg12[%c0_43, %c0_44, %c0_45] : memref<1x1x32xf32, #tpu.memory_space<vmem>>, vector<1x1x32xf32>
    %135 = vector.shape_cast %134 : vector<1x1x32xf32> to vector<1x32xf32>
    %c0_46 = arith.constant 0 : index
    %c0_47 = arith.constant 0 : index
    %c0_48 = arith.constant 0 : index
    %136 = vector.load %arg13[%c0_46, %c0_47, %c0_48] : memref<1x1x32xf32, #tpu.memory_space<vmem>>, vector<1x1x32xf32>
    %137 = vector.shape_cast %136 : vector<1x1x32xf32> to vector<1x32xf32>
    %cst_49 = arith.constant dense<0.000000e+00> : vector<32xf32>
    %138 = vector.multi_reduction <add>, %133, %cst_49 [1] : vector<32x32xf32> to vector<32xf32>
    %139 = vector.shape_cast %138 : vector<32xf32> to vector<32x1xf32>
    %cst_50 = arith.constant 3.200000e+01 : f32
    %140 = vector.broadcast %cst_50 : f32 to vector<32x1xf32>
    %141 = arith.divf %139, %140 : vector<32x1xf32>
    %142 = vector.broadcast %141 : vector<32x1xf32> to vector<32x32xf32>
    %143 = arith.subf %133, %142 : vector<32x32xf32>
    %144 = arith.mulf %143, %143 : vector<32x32xf32>
    %cst_51 = arith.constant dense<0.000000e+00> : vector<32xf32>
    %145 = vector.multi_reduction <add>, %144, %cst_51 [1] : vector<32x32xf32> to vector<32xf32>
    %146 = vector.shape_cast %145 : vector<32xf32> to vector<32x1xf32>
    %cst_52 = arith.constant 3.200000e+01 : f32
    %147 = vector.broadcast %cst_52 : f32 to vector<32x1xf32>
    %148 = arith.divf %146, %147 : vector<32x1xf32>
    %cst_53 = arith.constant 9.99999997E-7 : f32
    %149 = vector.broadcast %cst_53 : f32 to vector<32x1xf32>
    %150 = arith.addf %148, %149 : vector<32x1xf32>
    %151 = math.rsqrt %150 : vector<32x1xf32>
    %152 = vector.broadcast %151 : vector<32x1xf32> to vector<32x32xf32>
    %153 = arith.mulf %143, %152 : vector<32x32xf32>
    %154 = vector.broadcast %135 : vector<1x32xf32> to vector<32x32xf32>
    %155 = arith.mulf %153, %154 : vector<32x32xf32>
    %156 = vector.broadcast %137 : vector<1x32xf32> to vector<32x32xf32>
    %157 = arith.addf %155, %156 : vector<32x32xf32>
    %c0_54 = arith.constant 0 : index
    %c0_55 = arith.constant 0 : index
    %c0_56 = arith.constant 0 : index
    %158 = vector.load %arg14[%c0_54, %c0_55, %c0_56] : memref<1x32x64xbf16, #tpu.memory_space<vmem>>, vector<1x32x64xbf16>
    %159 = vector.shape_cast %158 : vector<1x32x64xbf16> to vector<32x64xbf16>
    %160 = arith.truncf %157 : vector<32x32xf32> to vector<32x32xbf16>
    %cst_57 = arith.constant dense<0.000000e+00> : vector<32x64xf32>
    %161 = tpu.matmul %160, %159, %cst_57 {dimension_numbers = #tpu.dot_dimension_numbers<[1], [0], [0], [1], [0, 0, 1, 1], [], []>} : vector<32x32xbf16>, vector<32x64xbf16>, vector<32x64xf32> -> vector<32x64xf32>
    %c0_58 = arith.constant 0 : index
    %c0_59 = arith.constant 0 : index
    %c0_60 = arith.constant 0 : index
    %162 = vector.load %arg15[%c0_58, %c0_59, %c0_60] : memref<1x1x64xf32, #tpu.memory_space<vmem>>, vector<1x1x64xf32>
    %163 = vector.shape_cast %162 : vector<1x1x64xf32> to vector<1x64xf32>
    %164 = vector.broadcast %163 : vector<1x64xf32> to vector<32x64xf32>
    %165 = arith.addf %161, %164 : vector<32x64xf32>
    %cst_61 = arith.constant 5.000000e-01 : f32
    %166 = vector.broadcast %cst_61 : f32 to vector<32x64xf32>
    %167 = arith.mulf %166, %165 : vector<32x64xf32>
    %cst_62 = arith.constant 0.707106769 : f32
    %168 = vector.broadcast %cst_62 : f32 to vector<32x64xf32>
    %169 = arith.mulf %165, %168 : vector<32x64xf32>
    %170 = math.absf %169 : vector<32x64xf32>
    %cst_63 = arith.constant 0.327591091 : f32
    %171 = vector.broadcast %cst_63 : f32 to vector<32x64xf32>
    %172 = arith.mulf %171, %170 : vector<32x64xf32>
    %cst_64 = arith.constant 1.000000e+00 : f32
    %173 = vector.broadcast %cst_64 : f32 to vector<32x64xf32>
    %174 = arith.addf %173, %172 : vector<32x64xf32>
    %cst_65 = arith.constant 1.000000e+00 : f32
    %175 = vector.broadcast %cst_65 : f32 to vector<32x64xf32>
    %176 = arith.divf %175, %174 : vector<32x64xf32>
    %cst_66 = arith.constant 1.06140542 : f32
    %177 = vector.broadcast %cst_66 : f32 to vector<32x64xf32>
    %178 = arith.mulf %176, %177 : vector<32x64xf32>
    %cst_67 = arith.constant -1.45315206 : f32
    %179 = vector.broadcast %cst_67 : f32 to vector<32x64xf32>
    %180 = arith.addf %179, %178 : vector<32x64xf32>
    %181 = arith.mulf %176, %180 : vector<32x64xf32>
    %cst_68 = arith.constant 1.42141378 : f32
    %182 = vector.broadcast %cst_68 : f32 to vector<32x64xf32>
    %183 = arith.addf %182, %181 : vector<32x64xf32>
    %184 = arith.mulf %176, %183 : vector<32x64xf32>
    %cst_69 = arith.constant -0.284496725 : f32
    %185 = vector.broadcast %cst_69 : f32 to vector<32x64xf32>
    %186 = arith.addf %185, %184 : vector<32x64xf32>
    %187 = arith.mulf %176, %186 : vector<32x64xf32>
    %cst_70 = arith.constant 0.254829586 : f32
    %188 = vector.broadcast %cst_70 : f32 to vector<32x64xf32>
    %189 = arith.addf %188, %187 : vector<32x64xf32>
    %190 = arith.mulf %176, %189 : vector<32x64xf32>
    %cst_71 = arith.constant 0.000000e+00 : f32
    %191 = vector.broadcast %cst_71 : f32 to vector<32x64xf32>
    %192 = arith.subf %191, %170 : vector<32x64xf32>
    %193 = arith.mulf %192, %170 : vector<32x64xf32>
    %194 = math.exp %193 : vector<32x64xf32>
    %195 = arith.mulf %190, %194 : vector<32x64xf32>
    %cst_72 = arith.constant 1.000000e+00 : f32
    %196 = vector.broadcast %cst_72 : f32 to vector<32x64xf32>
    %197 = arith.subf %196, %195 : vector<32x64xf32>
    %cst_73 = arith.constant 0.000000e+00 : f32
    %198 = vector.broadcast %cst_73 : f32 to vector<32x64xf32>
    %199 = arith.cmpf oge, %169, %198 : vector<32x64xf32>
    %cst_74 = arith.constant 0.000000e+00 : f32
    %200 = vector.broadcast %cst_74 : f32 to vector<32x64xf32>
    %201 = arith.subf %200, %197 : vector<32x64xf32>
    %202 = arith.select %199, %197, %201 : vector<32x64xi1>, vector<32x64xf32>
    %cst_75 = arith.constant 1.000000e+00 : f32
    %203 = vector.broadcast %cst_75 : f32 to vector<32x64xf32>
    %204 = arith.addf %203, %202 : vector<32x64xf32>
    %205 = arith.mulf %167, %204 : vector<32x64xf32>
    %c0_76 = arith.constant 0 : index
    %c0_77 = arith.constant 0 : index
    %c0_78 = arith.constant 0 : index
    %206 = vector.load %arg16[%c0_76, %c0_77, %c0_78] : memref<1x64x32xbf16, #tpu.memory_space<vmem>>, vector<1x64x32xbf16>
    %207 = vector.shape_cast %206 : vector<1x64x32xbf16> to vector<64x32xbf16>
    %208 = arith.truncf %205 : vector<32x64xf32> to vector<32x64xbf16>
    %cst_79 = arith.constant dense<0.000000e+00> : vector<32x32xf32>
    %209 = tpu.matmul %208, %207, %cst_79 {dimension_numbers = #tpu.dot_dimension_numbers<[1], [0], [0], [1], [0, 0, 1, 1], [], []>} : vector<32x64xbf16>, vector<64x32xbf16>, vector<32x32xf32> -> vector<32x32xf32>
    %210 = arith.addf %133, %209 : vector<32x32xf32>
    %c0_80 = arith.constant 0 : index
    %c0_81 = arith.constant 0 : index
    %c0_82 = arith.constant 0 : index
    %211 = vector.load %arg17[%c0_80, %c0_81, %c0_82] : memref<1x1x32xf32, #tpu.memory_space<vmem>>, vector<1x1x32xf32>
    %212 = vector.shape_cast %211 : vector<1x1x32xf32> to vector<1x32xf32>
    %213 = vector.broadcast %212 : vector<1x32xf32> to vector<32x32xf32>
    %214 = arith.addf %210, %213 : vector<32x32xf32>
    %c0_83 = arith.constant 0 : index
    %c0_84 = arith.constant 0 : index
    %215 = vector.load %arg21[%c0_83, %c0_84] : memref<32x32xf32, #tpu.memory_space<vmem>>, vector<32x32xf32>
    tpu.vector_store %arg21[%c0_83, %c0_84], %214 {strides = array<i32>} : memref<32x32xf32, #tpu.memory_space<vmem>>, vector<32x32xf32>,
    %c1_i32 = arith.constant 1 : i32
    %216 = arith.cmpi eq, %arg1, %c1_i32 : i32
    %217 = arith.extui %216 : i1 to i32
    %c0_i32_85 = arith.constant 0 : i32
    %218 = arith.cmpi ne, %217, %c0_i32_85 : i32
    scf.if %218 {
      %c0_86 = arith.constant 0 : index
      %c0_87 = arith.constant 0 : index
      %219 = vector.load %arg18[%c0_86, %c0_87] : memref<1x32xf32, #tpu.memory_space<vmem>>, vector<1x32xf32>
      %c0_88 = arith.constant 0 : index
      %c0_89 = arith.constant 0 : index
      %220 = vector.load %arg19[%c0_88, %c0_89] : memref<1x32xf32, #tpu.memory_space<vmem>>, vector<1x32xf32>
      %cst_90 = arith.constant dense<0.000000e+00> : vector<32xf32>
      %221 = vector.multi_reduction <add>, %214, %cst_90 [1] : vector<32x32xf32> to vector<32xf32>
      %222 = vector.shape_cast %221 : vector<32xf32> to vector<32x1xf32>
      %cst_91 = arith.constant 3.200000e+01 : f32
      %223 = vector.broadcast %cst_91 : f32 to vector<32x1xf32>
      %224 = arith.divf %222, %223 : vector<32x1xf32>
      %225 = vector.broadcast %224 : vector<32x1xf32> to vector<32x32xf32>
      %226 = arith.subf %214, %225 : vector<32x32xf32>
      %227 = arith.mulf %226, %226 : vector<32x32xf32>
      %cst_92 = arith.constant dense<0.000000e+00> : vector<32xf32>
      %228 = vector.multi_reduction <add>, %227, %cst_92 [1] : vector<32x32xf32> to vector<32xf32>
      %229 = vector.shape_cast %228 : vector<32xf32> to vector<32x1xf32>
      %cst_93 = arith.constant 3.200000e+01 : f32
      %230 = vector.broadcast %cst_93 : f32 to vector<32x1xf32>
      %231 = arith.divf %229, %230 : vector<32x1xf32>
      %cst_94 = arith.constant 9.99999997E-7 : f32
      %232 = vector.broadcast %cst_94 : f32 to vector<32x1xf32>
      %233 = arith.addf %231, %232 : vector<32x1xf32>
      %234 = math.rsqrt %233 : vector<32x1xf32>
      %235 = vector.broadcast %234 : vector<32x1xf32> to vector<32x32xf32>
      %236 = arith.mulf %226, %235 : vector<32x32xf32>
      %237 = vector.broadcast %219 : vector<1x32xf32> to vector<32x32xf32>
      %238 = arith.mulf %236, %237 : vector<32x32xf32>
      %239 = vector.broadcast %220 : vector<1x32xf32> to vector<32x32xf32>
      %240 = arith.addf %238, %239 : vector<32x32xf32>
      %241 = vector.shape_cast %240 : vector<32x32xf32> to vector<2x16x32xf32>
      %c0_95 = arith.constant 0 : index
      %c0_96 = arith.constant 0 : index
      %c0_97 = arith.constant 0 : index
      %242 = vector.load %arg20[%c0_95, %c0_96, %c0_97] : memref<2x16x32xf32, #tpu.memory_space<vmem>>, vector<2x16x32xf32>
      tpu.vector_store %arg20[%c0_95, %c0_96, %c0_97], %241 {strides = array<i32>} : memref<2x16x32xf32, #tpu.memory_space<vmem>>, vector<2x16x32xf32>,
    } else {
    }
    return
  }
  func.func @transform_0(%arg0: i32, %arg1: i32) -> (i32, i32, i32) {
    %c0_i32 = arith.constant 0 : i32
    %c0_i32_0 = arith.constant 0 : i32
    %c0_i32_1 = arith.constant 0 : i32
    return %arg0, %c0_i32, %c0_i32_0 : i32, i32, i32
  }
  func.func @transform_1(%arg0: i32, %arg1: i32) -> (i32, i32) {
    %c0_i32 = arith.constant 0 : i32
    %c0_i32_0 = arith.constant 0 : i32
    %c0_i32_1 = arith.constant 0 : i32
    return %c0_i32, %c0_i32_0 : i32, i32
  }
  func.func @transform_2(%arg0: i32, %arg1: i32) -> (i32, i32) {
    %c0_i32 = arith.constant 0 : i32
    %c0_i32_0 = arith.constant 0 : i32
    %c0_i32_1 = arith.constant 0 : i32
    return %c0_i32, %c0_i32_0 : i32, i32
  }
  func.func @transform_3(%arg0: i32, %arg1: i32) -> (i32, i32) {
    %c0_i32 = arith.constant 0 : i32
    %c0_i32_0 = arith.constant 0 : i32
    %c0_i32_1 = arith.constant 0 : i32
    return %c0_i32, %c0_i32_0 : i32, i32
  }
  func.func @transform_4(%arg0: i32, %arg1: i32) -> (i32, i32, i32) {
    %c0_i32 = arith.constant 0 : i32
    %c0_i32_0 = arith.constant 0 : i32
    %c0_i32_1 = arith.constant 0 : i32
    return %arg1, %c0_i32, %c0_i32_0 : i32, i32, i32
  }
  func.func @transform_5(%arg0: i32, %arg1: i32) -> (i32, i32, i32) {
    %c0_i32 = arith.constant 0 : i32
    %c0_i32_0 = arith.constant 0 : i32
    %c0_i32_1 = arith.constant 0 : i32
    return %arg1, %c0_i32, %c0_i32_0 : i32, i32, i32
  }
  func.func @transform_6(%arg0: i32, %arg1: i32) -> (i32, i32, i32) {
    %c0_i32 = arith.constant 0 : i32
    %c0_i32_0 = arith.constant 0 : i32
    %c0_i32_1 = arith.constant 0 : i32
    return %arg1, %c0_i32, %c0_i32_0 : i32, i32, i32
  }
  func.func @transform_7(%arg0: i32, %arg1: i32) -> (i32, i32, i32) {
    %c0_i32 = arith.constant 0 : i32
    %c0_i32_0 = arith.constant 0 : i32
    %c0_i32_1 = arith.constant 0 : i32
    return %arg1, %c0_i32, %c0_i32_0 : i32, i32, i32
  }
  func.func @transform_8(%arg0: i32, %arg1: i32) -> (i32, i32, i32) {
    %c0_i32 = arith.constant 0 : i32
    %c0_i32_0 = arith.constant 0 : i32
    %c0_i32_1 = arith.constant 0 : i32
    return %arg1, %c0_i32, %c0_i32_0 : i32, i32, i32
  }
  func.func @transform_9(%arg0: i32, %arg1: i32) -> (i32, i32, i32) {
    %c0_i32 = arith.constant 0 : i32
    %c0_i32_0 = arith.constant 0 : i32
    %c0_i32_1 = arith.constant 0 : i32
    return %arg1, %c0_i32, %c0_i32_0 : i32, i32, i32
  }
  func.func @transform_10(%arg0: i32, %arg1: i32) -> (i32, i32, i32) {
    %c0_i32 = arith.constant 0 : i32
    %c0_i32_0 = arith.constant 0 : i32
    %c0_i32_1 = arith.constant 0 : i32
    return %arg1, %c0_i32, %c0_i32_0 : i32, i32, i32
  }
  func.func @transform_11(%arg0: i32, %arg1: i32) -> (i32, i32, i32) {
    %c0_i32 = arith.constant 0 : i32
    %c0_i32_0 = arith.constant 0 : i32
    %c0_i32_1 = arith.constant 0 : i32
    return %arg1, %c0_i32, %c0_i32_0 : i32, i32, i32
  }
  func.func @transform_12(%arg0: i32, %arg1: i32) -> (i32, i32, i32) {
    %c0_i32 = arith.constant 0 : i32
    %c0_i32_0 = arith.constant 0 : i32
    %c0_i32_1 = arith.constant 0 : i32
    return %arg1, %c0_i32, %c0_i32_0 : i32, i32, i32
  }
  func.func @transform_13(%arg0: i32, %arg1: i32) -> (i32, i32, i32) {
    %c0_i32 = arith.constant 0 : i32
    %c0_i32_0 = arith.constant 0 : i32
    %c0_i32_1 = arith.constant 0 : i32
    return %arg1, %c0_i32, %c0_i32_0 : i32, i32, i32
  }
  func.func @transform_14(%arg0: i32, %arg1: i32) -> (i32, i32, i32) {
    %c0_i32 = arith.constant 0 : i32
    %c0_i32_0 = arith.constant 0 : i32
    %c0_i32_1 = arith.constant 0 : i32
    return %arg1, %c0_i32, %c0_i32_0 : i32, i32, i32
  }
  func.func @transform_15(%arg0: i32, %arg1: i32) -> (i32, i32, i32) {
    %c0_i32 = arith.constant 0 : i32
    %c0_i32_0 = arith.constant 0 : i32
    %c0_i32_1 = arith.constant 0 : i32
    return %arg1, %c0_i32, %c0_i32_0 : i32, i32, i32
  }
  func.func @transform_16(%arg0: i32, %arg1: i32) -> (i32, i32) {
    %c0_i32 = arith.constant 0 : i32
    %c0_i32_0 = arith.constant 0 : i32
    %c0_i32_1 = arith.constant 0 : i32
    return %c0_i32, %c0_i32_0 : i32, i32
  }
  func.func @transform_17(%arg0: i32, %arg1: i32) -> (i32, i32) {
    %c0_i32 = arith.constant 0 : i32
    %c0_i32_0 = arith.constant 0 : i32
    %c0_i32_1 = arith.constant 0 : i32
    return %c0_i32, %c0_i32_0 : i32, i32
  }
  func.func @transform_18(%arg0: i32, %arg1: i32) -> (i32, i32, i32) {
    %c0_i32 = arith.constant 0 : i32
    %c0_i32_0 = arith.constant 0 : i32
    %c0_i32_1 = arith.constant 0 : i32
    return %arg0, %c0_i32, %c0_i32_0 : i32, i32, i32
  }
}

</mosaic_0001>

<bundles_post_ra>
// kernel: _lambda_.1
= control target key start
LH: loop header
LB: loop body
LE: loop exit
PB: predicated region body
PF: predicated region fallthrough
CT: control target
= control target key end

     0   :  { %s3473_s0 = inlined_call_operand.vmem [shape: f32[2,16,48], index: 0, kind: input, shape index: {}]   ;;  %s3474_s1 = inlined_call_operand.vmem [shape: bf16[48,32], index: 1, kind: input, shape index: {}]   ;;  %s3475_s2 = inlined_call_operand.vmem [shape: f32[1,32], index: 2, kind: input, shape index: {}]   ;;  %s3476_s3 = inlined_call_operand.vmem [shape: f32[16,32], index: 3, kind: input, shape index: {}]   ;;  %s3477_s4 = inlined_call_operand.vmem [shape: f32[2,1,32], index: 4, kind: input, shape index: {}]   ;;  %s3478_s5 = inlined_call_operand.vmem [shape: f32[2,1,32], index: 5, kind: input, shape index: {}]   ;;  %s3479_s6 = inlined_call_operand.vmem [shape: bf16[2,32,96], index: 6, kind: input, shape index: {}]   ;;  %s3480_s7 = inlined_call_operand.vmem [shape: f32[2,1,96], index: 7, kind: input, shape index: {}]   ;;  %s3481_s8 = inlined_call_operand.vmem [shape: bf16[2,32,32], index: 8, kind: input, shape index: {}]   ;;  %s3482_s9 = inlined_call_operand.vmem [shape: f32[2,1,32], index: 9, kind: input, shape index: {}]   ;;  %s3483_s10 = inlined_call_operand.vmem [shape: f32[2,1,32], index: 10, kind: input, shape index: {}]   ;;  %s3484_s11 = inlined_call_operand.vmem [shape: f32[2,1,32], index: 11, kind: input, shape index: {}]   ;;  %s3485_s12 = inlined_call_operand.vmem [shape: bf16[2,32,64], index: 12, kind: input, shape index: {}]   ;;  %s3486_s13 = inlined_call_operand.vmem [shape: f32[2,1,64], index: 13, kind: input, shape index: {}]   ;;  %s3487_s14 = inlined_call_operand.vmem [shape: bf16[2,64,32], index: 14, kind: input, shape index: {}]   ;;  %s3488_s15 = inlined_call_operand.vmem [shape: f32[2,1,32], index: 15, kind: input, shape index: {}]   ;;  %s3489_s16 = inlined_call_operand.vmem [shape: f32[1,32], index: 16, kind: input, shape index: {}]   ;;  %s3490_s17 = inlined_call_operand.vmem [shape: f32[1,32], index: 17, kind: input, shape index: {}]   ;;  %s3491_s18 = inlined_call_operand.hbm [shape: f32[2,16,32], index: 18, kind: output, shape index: {}]  }
   0x1   :  { %3497 = sst [smem:[#allocation10_spill]] %s3473_s0 }
   0x2   :  { %3498 = sst [smem:[#allocation11_spill]] %s3474_s1 }
   0x3   :  { %3499 = sst [smem:[#allocation12_spill]] %s3475_s2 }
   0x4   :  { %3500 = sst [smem:[#allocation13_spill]] %s3479_s6 }
   0x5   :  { %3501 = sst [smem:[#allocation14_spill]] %s3481_s8 }
   0x6   :  { %3502 = sst [smem:[#allocation15_spill]] %s3489_s16 }
   0x7   :  { %3503 = sst [smem:[#allocation16_spill]] %s3490_s17 }
   0x8   :  { %3504 = sst [smem:[#allocation17_spill]] %s3491_s18 }
   0x9   :  { %23 = vsyncpa [#allocation4], 0  ;;  %s2916_s27 = smov 0   ;;  %s2918_s28 = smov 0  }
   0xa   :  { %s2920_s29 = smov 0  }
   0xb LB: > { %3505 = sst [smem:[#allocation6_spill]] %s2798_s28  ;;  %s38_s0 = sadd.s32 1, %s2798_s28  ;;  %s2802_s29 = sphi %s2920_s29, %s29_s29   ;;  %s2798_s28 = sphi %s2918_s28, %s3527_s28   ;;  %s2794_s27 = sphi %s2916_s27, %s3526_s27  }
   0xc   : > { %3506 = sst [smem:[#allocation7_spill]] %s2802_s29  ;;  %p39_p0 = scmp.ge.s32.totalorder %s38_s0, 2 }
   0xd   : > { %p2437_p1 = scmp.ge.s32.totalorder %s2802_s29, 1  ;;  %p631_p2 = scmp.lt.s32.totalorder %s2802_s29, 3 }
   0xe   : > { %s3529_s0 = smov (%p39_p0, %s38_s0), 0 }
   0xf   : > { %3507 = sst [smem:[#allocation8_spill]] %s3529_s0  ;;  %p632_p3 = pnand %p2437_p1, %p631_p2 }
  0x11   : > { %635 = sbr.rel (%p632_p3) target bundleno = 2528 (0x9e0), region = 92 }
  0x16   : > { %p732_p4 = scmp.lt.s32.totalorder %s2794_s27, 1  ;;  %s3508_s6 = sld [smem:[#allocation13_spill]] }
  0x17   : > { %s3509_s8 = sld [smem:[#allocation14_spill]]  ;;  %p2446_p5 = scmp.ne.s32.totalorder %s2794_s27, 0 }
  0x18   : > { %s2939_s19 = scalar_select %p732_p4, %s2794_s27, 1 }
  0x19   : > { %s3511_s1 = sld [smem:[#allocation11_spill]] (!%p2446_p5) }
  0x1a   : > { %s2530_s24 = sshll.u32 %s2939_s19, 4  ;;  %s756_s16 = scalar_lea.vmem %s3483_s10, %s2939_s19 }
  0x1b   : > { %s759_s30 = scalar_lea.vmem %s3484_s11, %s2939_s19  ;;  %781 = sbr.rel (%p2446_p5) target bundleno = 184 (0xb8), region = 96 }
  0x1c   : > { %s2957_s0 = scalar_lea.vmem %s3508_s6, %s2530_s24  ;;  %s2979_s6 = scalar_lea.vmem %s3485_s12, %s2530_s24 }
  0x1d   : > { %s2962_s29 = scalar_lea.vmem %s3509_s8, %s2530_s24  ;;  %s767_s8 = scalar_lea.vmem %s3486_s13, %s2939_s19 }
  0x1e   : > { %3510 = sst [smem:[#allocation9_spill]] %s2962_s29  ;;  %s2533_s29 = sshll.u32 %s2939_s19, 5 }
  0x1f   : > { %s2989_s22 = scalar_lea.vmem %s3487_s14, %s2533_s29  ;;  %s3512_s23 = sld [smem:[#allocation10_spill]] (!%p2446_p5) }
  0x20   : > { %v2536_v0 = vld [vmem:[%s3511_s1 + $0x10] sm:$0xff]  ;;  %v2535_v1 = vld [vmem:[%s3511_s1 + $0x8] sm:$0xff]  ;;  %v2534_v2 = vld [vmem:[%s3511_s1] sm:$0xff]  ;;  %vm816_vm0 = vcmask 392192   ;;  %s3513_s17 = sld [smem:[#allocation12_spill]]  ;;  %vm848_vm1 = vcmask 261120  }
  0x21   : > { %828 = vmatpush.bf16.msra.mxu0 %v2536_v0  ;;  %2547 = vmatpush.bf16.msra.mxu1 %v2536_v0  ;;  %v842_v11 = vld [vmem:[%s3476_s3] sm:$0xff]  ;;  %v843_v18 = vld [vmem:[%s3476_s3 + $0x8] sm:$0xff] }
  0x25   : > { %v782_v3 = vld [vmem:[%s3512_s23] sm:$0xff]  ;;  %829 = vmatpush.bf16.msra.mxu0 %v2535_v1  ;;  %2548 = vmatpush.bf16.msra.mxu1 %v2535_v1  ;;  %v783_v4 = vld [vmem:[%s3512_s23 + $0x8] sm:$0xff]  ;;  %v784_v5 = vld [vmem:[%s3512_s23 + $0x10] sm:$0xff] }
  0x26   : > { %v785_v6 = vld [vmem:[%s3512_s23 + $0x18] sm:$0xff]  ;;  %v792_v7 = vpack.c.bf16 %v783_v4, %v782_v3  ;;  %v2597_v9 = vld [vmem:[%s3513_s17] ss:$0 sm:$0xff] }
  0x27   : > { %v793_v8 = vpack.c.bf16 %v785_v6, %v784_v5 }
  0x29   : > { %830 = vmatpush.bf16.msra.mxu0 %v2534_v2  ;;  %2549 = vmatpush.bf16.msra.mxu1 %v2534_v2 }
  0x2c   : > { %2459 = vmatmul.msk.bf16.vlgmr.msra.gmra.mxu0 %vm816_vm0, %v792_v7  ;;  %2460 = vmatmul.msk.bf16.vlgmr.msra.gmra.mxu1 %vm816_vm0, %v793_v8 }
  0xa9   : > { %v832_v10 = vpop.f32.mrf.mxu0  ;;  %v837_v12 = vpop.f32.mrf.mxu1 }
  0xaa   : > { %v833_v13 = vadd.f32 %v2597_v9, %v832_v10  ;;  %v838_v14 = vadd.f32 %v2597_v9, %v837_v12 }
  0xac   : > { %v844_v15 = vadd.f32 %v842_v11, %v833_v13  ;;  %v846_v16 = vadd.f32 %v842_v11, %v838_v14 }
  0xae   : > { %849 = vst.msk [vmem:[#allocation2] sm:$0xff] %vm848_vm1, %v844_v15 }
  0xaf   : > { %851 = vst.msk [vmem:[#allocation2 + $0x10] sm:$0xff] %vm848_vm1, %v846_v16 }
  0xb1   : > { %v834_v17 = vpop.f32.mrf.mxu0  ;;  %v839_v19 = vpop.f32.mrf.mxu1 }
  0xb2   : > { %v835_v20 = vadd.f32 %v2597_v9, %v834_v17  ;;  %v840_v21 = vadd.f32 %v2597_v9, %v839_v19 }
  0xb4   : > { %v845_v22 = vadd.f32 %v843_v18, %v835_v20  ;;  %v847_v23 = vadd.f32 %v843_v18, %v840_v21 }
  0xb6   : > { %850 = vst.msk [vmem:[#allocation2 + $0x8] sm:$0xff] %vm848_vm1, %v845_v22 }
  0xb7   : > { %852 = vst.msk [vmem:[#allocation2 + $0x18] sm:$0xff] %vm848_vm1, %v847_v23 }
  0xb8 PF: > { %v855_v24 = vld [vmem:[#allocation2 + $0x10] sm:$0xff]  ;;  %vm859_vm2 = vcmask 261120   ;;  %v853_v25 = vld [vmem:[#allocation2] sm:$0xff]  ;;  %v2804_v32 = vmov 32.0   ;;  %v2538_v59 = vld [vmem:[%s2957_s0 + $0x8] sm:$0xff]  ;;  %s3514_s20 = scalar_lea.vmem %s3477_s4, %s2939_s19  ;;  %s3515_s29 = scalar_lea.vmem %s3478_s5, %s2939_s19  ;;  %vm1040_vm0 = vcmask 64512  }
  0xb9   : > { %v866_v26 = vsel %vm859_vm2, %v855_v24, 0.0  ;;  %v860_v27 = vsel %vm859_vm2, %v853_v25, 0.0  ;;  %2636 = vrcp.f32 %v2804_v32  ;;  %1003 = vmatpush.bf16.msra.mxu0 %v2538_v59  ;;  %v2537_v63 = vld [vmem:[%s2957_s0] sm:$0xff]  ;;  %s3516_s21 = scalar_lea.vmem %s3480_s7, %s2939_s19  ;;  %s2805_s2 = smov 88   ;;  %vm1093_vm1 = vcmask 130048  }
  0xba   : > { %867 = vadd.xlane.f32.xlu1 %v866_v26  ;;  %861 = vadd.xlane.f32.xlu0 %v860_v27  ;;  %s2806_s26 = smov 96   ;;  %s2807_s0 = smov 120  }
  0xbb   : > { %s2808_s24 = smov 112   ;;  %s2810_s18 = smov 80  }
  0xbc   : > { %s2811_s28 = smov 104   ;;  %s2813_s17 = smov 56  }
  0xbd   : > { %v854_v29 = vld [vmem:[#allocation2 + $0x8] sm:$0xff]  ;;  %1004 = vmatpush.bf16.msra.mxu0 %v2537_v63  ;;  %s2814_s25 = smov 48   ;;  %p2525_p6 = scmp.ne.s32.totalorder %s2794_s27, 1 }
  0xbe   : > { %v856_v28 = vld [vmem:[#allocation2 + $0x18] sm:$0xff]  ;;  %v863_v31 = vsel %vm859_vm2, %v854_v29, 0.0 }
  0xbf   : > { %v869_v30 = vsel %vm859_vm2, %v856_v28, 0.0  ;;  %v2637_v33 = vpop.eup %2636 }
  0xc0   : > { %v873_v34 = vmul.f32 32.0, %v2637_v33  ;;  %vm877_vm3 = vweird.f32 %v2637_v33 }
  0xc2   : > { %870 = vadd.xlane.f32.xlu1 %v869_v30  ;;  %864 = vadd.xlane.f32.xlu0 %v863_v31  ;;  %v874_v35 = vsub.f32 1.0, %v873_v34 }
  0xc4   : > { %v875_v36 = vmul.f32 %v2637_v33, %v874_v35 }
  0xc6   : > { %v876_v37 = vadd.f32 %v2637_v33, %v875_v36  ;;  %v2629_v36 = vld [vmem:[%s3515_s29] ss:$0 sm:$0xff]  ;;  %s2812_s29 = smov 64  }
  0xc8   : > { %v3030_v38 = vsel %vm877_vm3, %v2637_v33, %v876_v37  ;;  %vm1686_vm3 = vcmask 195584  }
 0x12d   : > { %v868_v39 = vpop.xlane.xlu1 %867  ;;  %v862_v40 = vpop.xlane.xlu0 %861 }
 0x12e   : > { %v881_v41 = vmul.f32 %v3030_v38, %v868_v39  ;;  %v879_v42 = vmul.f32 %v3030_v38, %v862_v40 }
 0x130   : > { %v3034_v43 = vsub.f32 %v855_v24, %v881_v41  ;;  %v883_v44 = vsub.f32 %v853_v25, %v879_v42 }
 0x132   : > { %v889_v45 = vmul.f32 %v3034_v43, %v3034_v43  ;;  %v887_v46 = vmul.f32 %v883_v44, %v883_v44 }
 0x134   : > { %v897_v47 = vsel %vm859_vm2, %v889_v45, 0.0  ;;  %v891_v48 = vsel %vm859_vm2, %v887_v46, 0.0 }
 0x135   : > { %v871_v49 = vpop.xlane.xlu1 %870  ;;  %898 = vadd.xlane.f32.xlu0 %v897_v47  ;;  %892 = vadd.xlane.f32.xlu2 %v891_v48  ;;  %v865_v50 = vpop.xlane.xlu0 %864 }
 0x136   : > { %v882_v51 = vmul.f32 %v3030_v38, %v871_v49  ;;  %v880_v52 = vmul.f32 %v3030_v38, %v865_v50 }
 0x138   : > { %v3042_v53 = vsub.f32 %v856_v28, %v882_v51  ;;  %v884_v54 = vsub.f32 %v854_v29, %v880_v52  ;;  %v2628_v29 = vld [vmem:[%s3514_s20] ss:$0 sm:$0xff]  ;;  %s2809_s20 = smov 72  }
 0x13a   : > { %v890_v55 = vmul.f32 %v3042_v53, %v3042_v53  ;;  %v888_v56 = vmul.f32 %v884_v54, %v884_v54 }
 0x13c   : > { %v900_v57 = vsel %vm859_vm2, %v890_v55, 0.0  ;;  %v894_v58 = vsel %vm859_vm2, %v888_v56, 0.0 }
 0x13d   : > { %901 = vadd.xlane.f32.xlu1 %v900_v57  ;;  %895 = vadd.xlane.f32.xlu2 %v894_v58  ;;  %v2630_v57 = vld [vmem:[%s3516_s21] ss:$0 sm:$0xff]  ;;  %s2815_s21 = smov 40  }
 0x1a8   : > { %v893_v60 = vpop.xlane.xlu2 %892  ;;  %v899_v62 = vpop.xlane.xlu0 %898 }
 0x1a9   : > { %v903_v61 = vmul.f32 %v893_v60, %v3030_v38  ;;  %v905_v1 = vmul.f32 %v899_v62, %v3030_v38 }
 0x1ab   : > { %v907_v0 = vadd.f32 1e-06, %v903_v61  ;;  %v909_v2 = vadd.f32 1e-06, %v905_v1 }
 0x1ad   : > { %2638 = vrsqrt.f32 %v907_v0  ;;  %vm917_vm5 = vweird.f32 %v907_v0  ;;  %vm937_vm12 = vweird.f32 %v909_v2 }
 0x1ae   : > { %2640 = vrsqrt.f32 %v909_v2 }
 0x1b0   : > { %v902_v3 = vpop.xlane.xlu1 %901  ;;  %v896_v4 = vpop.xlane.xlu2 %895 }
 0x1b1   : > { %v906_v5 = vmul.f32 %v902_v3, %v3030_v38  ;;  %v904_v6 = vmul.f32 %v896_v4, %v3030_v38 }
 0x1b3   : > { %v2639_v7 = vpop.eup %2638  ;;  %v910_v8 = vadd.f32 1e-06, %v906_v5  ;;  %v908_v9 = vadd.f32 1e-06, %v904_v6 }
 0x1b4   : > { %v912_v10 = vmul.f32 %v2639_v7, %v907_v0  ;;  %v2641_v13 = vpop.eup %2640  ;;  %vm918_vm4 = vweird.f32 %v2639_v7 }
 0x1b5   : > { %2642 = vrsqrt.f32 %v910_v8  ;;  %v932_v19 = vmul.f32 %v2641_v13, %v909_v2  ;;  %vm919_vm6 = vmor %vm917_vm5, %vm918_vm4  ;;  %vm927_vm8 = vweird.f32 %v908_v9  ;;  %vm947_vm10 = vweird.f32 %v910_v8 }
 0x1b6   : > { %v913_v11 = vmul.f32 %v2639_v7, %v912_v10  ;;  %2644 = vrsqrt.f32 %v908_v9  ;;  %vm938_vm13 = vweird.f32 %v2641_v13 }
 0x1b7   : > { %v933_v24 = vmul.f32 %v2641_v13, %v932_v19  ;;  %vm939_vm15 = vmor %vm937_vm12, %vm938_vm13 }
 0x1b8   : > { %v914_v12 = vmul.f32 0.5, %v913_v11 }
 0x1b9   : > { %v934_v30 = vmul.f32 0.5, %v933_v24 }
 0x1ba   : > { %v915_v14 = vsub.f32 1.5, %v914_v12 }
 0x1bb   : > { %v2643_v15 = vpop.eup %2642  ;;  %v935_v37 = vsub.f32 1.5, %v934_v30 }
 0x1bc   : > { %v2645_v16 = vpop.eup %2644  ;;  %v942_v17 = vmul.f32 %v2643_v15, %v910_v8  ;;  %v916_v18 = vmul.f32 %v2639_v7, %v915_v14  ;;  %vm948_vm11 = vweird.f32 %v2643_v15 }
 0x1bd   : > { %v922_v20 = vmul.f32 %v2645_v16, %v908_v9  ;;  %vm928_vm7 = vweird.f32 %v2645_v16  ;;  %vm949_vm14 = vmor %vm947_vm10, %vm948_vm11 }
 0x1be   : > { %v943_v21 = vmul.f32 %v2643_v15, %v942_v17  ;;  %v920_v23 = vsel %vm919_vm6, %v2639_v7, %v916_v18  ;;  %vm929_vm9 = vmor %vm927_vm8, %vm928_vm7 }
 0x1bf   : > { %v923_v22 = vmul.f32 %v2645_v16, %v922_v20  ;;  %v951_v28 = vmul.f32 %v920_v23, %v883_v44  ;;  %v936_v44 = vmul.f32 %v2641_v13, %v935_v37 }
 0x1c0   : > { %v944_v26 = vmul.f32 0.5, %v943_v21 }
 0x1c1   : > { %v924_v25 = vmul.f32 0.5, %v923_v22  ;;  %v958_v35 = vmul.f32 %v2628_v29, %v951_v28  ;;  %v940_v47 = vsel %vm939_vm15, %v2641_v13, %v936_v44 }
 0x1c2   : > { %v945_v32 = vsub.f32 1.5, %v944_v26  ;;  %v953_v49 = vmul.f32 %v940_v47, %v3034_v43 }
 0x1c3   : > { %v925_v27 = vsub.f32 1.5, %v924_v25  ;;  %v965_v41 = vadd.f32 %v2629_v36, %v958_v35 }
 0x1c4   : > { %v946_v40 = vmul.f32 %v2643_v15, %v945_v32  ;;  %v960_v51 = vmul.f32 %v2628_v29, %v953_v49 }
 0x1c5   : > { %v926_v31 = vmul.f32 %v2645_v16, %v925_v27 }
 0x1c6   : > { %v950_v46 = vsel %vm949_vm14, %v2643_v15, %v946_v40 }
 0x1c7   : > { %v930_v33 = vsel %vm929_vm9, %v2645_v16, %v926_v31  ;;  %v954_v48 = vmul.f32 %v950_v46, %v3042_v53 }
 0x1c8   : > { %v952_v34 = vmul.f32 %v930_v33, %v884_v54  ;;  %v967_v54 = vadd.f32 %v2629_v36, %v960_v51 }
 0x1c9   : > { %v961_v50 = vmul.f32 %v2628_v29, %v954_v48 }
 0x1ca   : > { %v959_v39 = vmul.f32 %v2628_v29, %v952_v34 }
 0x1cb   : > { %v968_v52 = vadd.f32 %v2629_v36, %v961_v50 }
 0x1cc   : > { %v966_v42 = vadd.f32 %v2629_v36, %v959_v39 }
 0x1cd   : > { %v974_v55 = vpack.c.bf16 %v968_v52, %v967_v54 }
 0x1ce   : > { %v973_v45 = vpack.c.bf16 %v966_v42, %v965_v41 }
 0x1d0   : > { %2469 = vmatmul.msk.bf16.vlgmr.msra.gmra.mxu0 %vm859_vm2, %v973_v45 }
 0x1e0   : > { %2470 = vmatmul.msk.bf16.gmra.mxu0 %vm859_vm2, %v974_v55 }
 0x24d   : > { %v1006_v56 = vpop.f32.mrf.mxu0 }
 0x24e   : > { %v1007_v58 = vadd.f32 %v2630_v57, %v1006_v56 }
 0x250   : > { %v1024_v60 = vpack.c.bf16 %v1007_v58, %v1007_v58  ;;  %v1016_v10 = vmul.f32 0.35355338, %v1007_v58 }
 0x252   : > { %v1035_v62 = vunpack.c.l.b16 %v1024_v60  ;;  %v1020_v18 = vpack.c.bf16 %v1016_v10, %v1016_v10 }
 0x254   : > { %v1030_v21 = vunpack.c.l.b16 %v1020_v18 }
 0x255   : > { %v1008_v59 = vpop.f32.mrf.mxu0 }
 0x256   : > { %v1009_v61 = vadd.f32 %v2630_v57, %v1008_v59 }
 0x258   : > { %v1025_v53 = vpack.c.bf16 %v1009_v61, %v1009_v61  ;;  %v1017_v6 = vmul.f32 0.35355338, %v1009_v61 }
 0x25a   : > { %v1036_v43 = vunpack.c.l.b16 %v1025_v53  ;;  %v1021_v14 = vpack.c.bf16 %v1017_v6, %v1017_v6 }
 0x25c   : > { %v3073_v63 = vpack.c.b16 %v1036_v43, %v1035_v62  ;;  %v1031_v20 = vunpack.c.l.b16 %v1021_v14 }
 0x25d   : > { %v1011_v0 = vpop.f32.mrf.mxu0 }
 0x25e   : > { %1194 = vrot.lane.b32.xlu1 %v3073_v63, %s2805_s2  ;;  %1038 = vrot.lane.b32.xlu0 %v3073_v63, %s2806_s26  ;;  %v1012_v1 = vadd.f32 %v2630_v57, %v1011_v0  ;;  %v1032_v22 = vpack.c.b16 %v1031_v20, %v1030_v21 }
 0x260   : > { %v1018_v2 = vmul.f32 0.35355338, %v1012_v1  ;;  %v1026_v4 = vpack.c.bf16 %v1012_v1, %v1012_v1 }
 0x262   : > { %v1022_v7 = vpack.c.bf16 %v1018_v2, %v1018_v2  ;;  %v1068_v11 = vunpack.c.l.b16 %v1026_v4 }
 0x264   : > { %v1063_v15 = vunpack.c.l.b16 %v1022_v7 }
 0x265   : > { %v1013_v3 = vpop.f32.mrf.mxu0 }
 0x266   : > { %v1014_v5 = vadd.f32 %v2630_v57, %v1013_v3 }
 0x268   : > { %v1019_v8 = vmul.f32 0.35355338, %v1014_v5  ;;  %v1027_v9 = vpack.c.bf16 %v1014_v5, %v1014_v5 }
 0x26a   : > { %v1023_v12 = vpack.c.bf16 %v1019_v8, %v1019_v8  ;;  %v1069_v13 = vunpack.c.l.b16 %v1027_v9 }
 0x26c   : > { %v1064_v16 = vunpack.c.l.b16 %v1023_v12  ;;  %v3077_v17 = vpack.c.b16 %v1069_v13, %v1068_v11 }
 0x26e   : > { %v1065_v19 = vpack.c.b16 %v1064_v16, %v1063_v15  ;;  %1218 = vrot.lane.b32.xlu0 %v3077_v17, %s2805_s2  ;;  %1071 = vrot.lane.b32.xlu2 %v3077_v17, %s2806_s26  ;;  %s2816_s2 = smov 8   ;;  %s2817_s26 = smov 16  }
 0x270   : > { %1216 = vrot.lane.b32.xlu1 %v1065_v19, %s2807_s0 }
 0x276   : > { %1338 = vrot.lane.b32.xlu0 %v1032_v22, %s2808_s24  ;;  %1192 = vrot.lane.b32.xlu2 %v1032_v22, %s2807_s0  ;;  %s3517_s0 = sld [smem:[#allocation9_spill]] }
 0x278   : > { %1486 = vrot.lane.b32.xlu1 %v3073_v63, %s2809_s20 }
 0x27e   : > { %1340 = vrot.lane.b32.xlu2 %v3073_v63, %s2810_s18  ;;  %1362 = vrot.lane.b32.xlu0 %v1065_v19, %s2808_s24  ;;  %s2818_s24 = smov 24  }
 0x280   : > { %1510 = vrot.lane.b32.xlu1 %v3077_v17, %s2809_s20  ;;  %s3521_s20 = sld [smem:[#allocation16_spill]] (!%p2525_p6) }
 0x286   : > { %1364 = vrot.lane.b32.xlu2 %v3077_v17, %s2810_s18  ;;  %1508 = vrot.lane.b32.xlu0 %v1065_v19, %s2811_s28 }
 0x288   : > { %1172 = vrot.lane.b32.xlu1 %v3077_v17, %s2812_s29 }
 0x28e   : > { %1484 = vrot.lane.b32.xlu2 %v1032_v22, %s2811_s28  ;;  %s3518_s28 = scalar_lea.vmem %s3482_s9, %s2939_s19 }
 0x290   : > { %1293 = vrot.lane.b32.xlu1 %v3073_v63, %s2813_s17 }
 0x298   : > { %1147 = vrot.lane.b32.xlu1 %v3073_v63, %s2812_s29 }
 0x2c8   : > { %v1072_v23 = vpop.permute.xlu2 %1071 }
 0x2c9   : > { %v1077_v24 = vsel %vm1040_vm0, %v1072_v23, 0 }
 0x2ca   : > { %1086 = vmatpush.bf16.xpose.msra.mxu2 %v1077_v24 }
 0x2d0   : > { %v1195_v25 = vpop.permute.xlu1 %1194  ;;  %v1193_v26 = vpop.permute.xlu2 %1192 }
 0x2d1   : > { %v1039_v27 = vpop.permute.xlu0 %1038  ;;  %2472 = vmatmul.msk.bf16.vlgmr.msra.gmra.mxu2 %vm1040_vm0, %v1065_v19  ;;  %v1200_v28 = vsel %vm1040_vm0, %v1195_v25, 0 }
 0x2d2   : > { %v1045_v29 = vsel %vm1040_vm0, %v1039_v27, 0 }
 0x2d3   : > { %1054 = vmatpush.bf16.xpose.msra.mxu1 %v1045_v29 }
 0x2d8   : > { %v1341_v30 = vpop.permute.xlu2 %1340 }
 0x2d9   : > { %v1346_v31 = vsel %vm1040_vm0, %v1341_v30, 0 }
 0x2da   : > { %2471 = vmatmul.msk.bf16.vlgmr.msra.gmra.mxu1 %vm1040_vm0, %v1032_v22 }
 0x2db   : > { %1209 = vmatpush.bf16.xpose.msrb.mxu1 %v1200_v28 }
 0x2e0   : > { %v1365_v32 = vpop.permute.xlu2 %1364  ;;  %v1219_v33 = vpop.permute.xlu0 %1218 }
 0x2e1   : > { %v1370_v34 = vsel %vm1040_vm0, %v1365_v32, 0  ;;  %v1224_v35 = vsel %vm1040_vm0, %v1219_v33, 0 }
 0x2e2   : > { %v1217_v36 = vpop.permute.xlu1 %1216  ;;  %1233 = vmatpush.bf16.xpose.msrb.mxu2 %v1224_v35 }
 0x2e3   : > { %1355 = vmatpush.bf16.xpose.msra.mxu1 %v1346_v31 }
 0x2e8   : > { %v1339_v40 = vpop.permute.xlu0 %1338  ;;  %v1485_v48 = vpop.permute.xlu2 %1484 }
 0x2e9   : > { %2476 = vmatmul.msk.bf16.vlgmr.msrb.gmra.mxu2 %vm1040_vm0, %v1217_v36 }
 0x2ea   : > { %1379 = vmatpush.bf16.xpose.msra.mxu2 %v1370_v34  ;;  %2475 = vmatmul.msk.bf16.vlgmr.msrb.gmra.mxu1 %vm1040_vm0, %v1193_v26  ;;  %v1487_v37 = vpop.permute.xlu1 %1486 }
 0x2eb   : > { %v1492_v39 = vsel %vm1040_vm0, %v1487_v37, 0 }
 0x2ec   : > { %1501 = vmatpush.bf16.xpose.msrb.mxu1 %v1492_v39 }
 0x2f0   : > { %v1363_v44 = vpop.permute.xlu0 %1362 }
 0x2f2   : > { %v1511_v41 = vpop.permute.xlu1 %1510 }
 0x2f3   : > { %v1516_v42 = vsel %vm1040_vm0, %v1511_v41, 0 }
 0x2f4   : > { %1525 = vmatpush.bf16.xpose.msrb.mxu2 %v1516_v42 }
 0x2f8   : > { %v1509_v47 = vpop.permute.xlu0 %1508 }
 0x2f9   : > { %2480 = vmatmul.msk.bf16.vlgmr.msra.gmra.mxu2 %vm1040_vm0, %v1363_v44 }
 0x2fa   : > { %2479 = vmatmul.msk.bf16.vlgmr.msra.gmra.mxu1 %vm1040_vm0, %v1339_v40  ;;  %v1173_v45 = vpop.permute.xlu1 %1172 }
 0x2fb   : > { %1185 = vmatpush.bf16.msra.mxu3 %v1173_v45 }
 0x302   : > { %v1294_v46 = vpop.permute.xlu1 %1293 }
 0x303   : > { %1306 = vmatpush.bf16.msrb.mxu3 %v1294_v46 }
 0x309   : > { %2484 = vmatmul.msk.bf16.vlgmr.msrb.gmra.mxu2 %vm1040_vm0, %v1509_v47 }
 0x30a   : > { %2483 = vmatmul.msk.bf16.vlgmr.msrb.gmra.mxu1 %vm1040_vm0, %v1485_v48  ;;  %v1148_v49 = vpop.permute.xlu1 %1147 }
 0x30b   : > { %1160 = vmatpush.bf16.msrb.mxu0 %v1148_v49 }
 0x354   : > { %v3105_v50 = vpop.f32.mrf.mxu2 }
 0x355   : > { %v1100_v51 = vsel %vm1093_vm1, %v3105_v50, -inf }
 0x356   : > { %1101 = vmax.xlane.f32.xlu2 %v1100_v51 }
 0x357   : > { %v1056_v52 = vpop.f32.mrf.mxu1 }
 0x358   : > { %v1094_v54 = vsel %vm1093_vm1, %v1056_v52, -inf }
 0x359   : > { %1095 = vmax.xlane.f32.xlu1 %v1094_v54 }
 0x35c   : > { %v1090_v55 = vpop.f32.mrf.mxu2 }
 0x35d   : > { %v1103_v57 = vsel %vm1093_vm1, %v1090_v55, -inf }
 0x35f   : > { %v1058_v56 = vpop.f32.mrf.mxu1 }
 0x360   : > { %v1097_v58 = vsel %vm1093_vm1, %v1058_v56, -inf }
 0x361   : > { %1104 = vmax.xlane.f32.xlu1 %v1103_v57  ;;  %1098 = vmax.xlane.f32.xlu0 %v1097_v58 }
 0x367   : > { %v1211_v59 = vpop.f32.mrf.mxu1 }
 0x368   : > { %v1240_v60 = vsel %vm1093_vm1, %v1211_v59, -inf }
 0x369   : > { %1241 = vmax.xlane.f32.xlu0 %v1240_v60 }
 0x36c   : > { %v3113_v61 = vpop.f32.mrf.mxu2 }
 0x36d   : > { %v1246_v43 = vsel %vm1093_vm1, %v3113_v61, -inf }
 0x36f   : > { %v3115_v53 = vpop.f32.mrf.mxu1 }
 0x370   : > { %v1243_v62 = vsel %vm1093_vm1, %v3115_v53, -inf }
 0x371   : > { %1244 = vmax.xlane.f32.xlu2 %v1243_v62  ;;  %1247 = vmax.xlane.f32.xlu0 %v1246_v43 }
 0x374   : > { %v3121_v0 = vpop.f32.mrf.mxu2 }
 0x375   : > { %v1249_v6 = vsel %vm1093_vm1, %v3121_v0, -inf }
 0x377   : > { %v3123_v1 = vpop.f32.mrf.mxu1 }
 0x378   : > { %v1386_v2 = vsel %vm1093_vm1, %v3123_v1, -inf }
 0x379   : > { %1387 = vmax.xlane.f32.xlu2 %v1386_v2 }
 0x37a   : > { %1439 = vrot.lane.b32.xlu1 %v3073_v63, %s2814_s25 }
 0x37c   : > { %v3129_v3 = vpop.f32.mrf.mxu2 }
 0x37d   : > { %v1392_v4 = vsel %vm1093_vm1, %v3129_v3, -inf }
 0x37e   : > { %1393 = vmax.xlane.f32.xlu0 %v1392_v4 }
 0x37f   : > { %v3133_v5 = vpop.f32.mrf.mxu1 }
 0x380   : > { %v1389_v16 = vsel %vm1093_vm1, %v3133_v5, -inf }
 0x381   : > { %1250 = vmax.xlane.f32.xlu2 %v1249_v6 }
 0x384   : > { %v3137_v7 = vpop.f32.mrf.mxu2 }
 0x385   : > { %v1395_v9 = vsel %vm1093_vm1, %v3137_v7, -inf }
 0x387   : > { %v3139_v8 = vpop.f32.mrf.mxu1 }
 0x388   : > { %v1532_v18 = vsel %vm1093_vm1, %v3139_v8, -inf }
 0x389   : > { %1396 = vmax.xlane.f32.xlu2 %v1395_v9 }
 0x38c   : > { %v3143_v10 = vpop.f32.mrf.mxu2 }
 0x38d   : > { %v1538_v15 = vsel %vm1093_vm1, %v3143_v10, -inf }
 0x38f   : > { %v3145_v11 = vpop.f32.mrf.mxu1 }
 0x390   : > { %v1535_v12 = vsel %vm1093_vm1, %v3145_v11, -inf }
 0x391   : > { %1536 = vmax.xlane.f32.xlu0 %v1535_v12 }
 0x394   : > { %v3149_v13 = vpop.f32.mrf.mxu2 }
 0x395   : > { %v1541_v14 = vsel %vm1093_vm1, %v3149_v13, -inf }
 0x396   : > { %1542 = vmax.xlane.f32.xlu2 %v1541_v14 }
 0x399   : > { %1539 = vmax.xlane.f32.xlu0 %v1538_v15 }
 0x3a4   : > { %1390 = vmax.xlane.f32.xlu1 %v1389_v16 }
 0x3ac   : > { %1533 = vmax.xlane.f32.xlu1 %v1532_v18 }
 0x3c9   : > { %v1102_v24 = vpop.xlane.xlu2 %1101 }
 0x3ca   : > { %v1108_v30 = vsub.f32 %v3105_v50, %v1102_v24 }
 0x3cc   : > { %v1096_v19 = vpop.xlane.xlu1 %1095  ;;  %v1114_v32 = vmul.f32 1.442695, %v1108_v30 }
 0x3cd   : > { %v1106_v20 = vsub.f32 %v1056_v52, %v1096_v19 }
 0x3cf   : > { %v1110_v21 = vmul.f32 1.442695, %v1106_v20 }
 0x3d1   : > { %2646 = vpow2.f32 %v1110_v21 }
 0x3d4   : > { %v1105_v22 = vpop.xlane.xlu1 %1104  ;;  %v1099_v23 = vpop.xlane.xlu0 %1098 }
 0x3d5   : > { %v1109_v25 = vsub.f32 %v1090_v55, %v1105_v22  ;;  %v1107_v26 = vsub.f32 %v1058_v56, %v1099_v23 }
 0x3d7   : > { %v3159_v27 = vpop.eup %2646  ;;  %v1116_v28 = vmul.f32 1.442695, %v1109_v25  ;;  %v1112_v29 = vmul.f32 1.442695, %v1107_v26 }
 0x3d8   : > { %v1118_v31 = vsel %vm1093_vm1, %v3159_v27, 0.0 }
 0x3d9   : > { %2648 = vpow2.f32 %v1116_v28  ;;  %1119 = vadd.xlane.f32.xlu0 %v1118_v31 }
 0x3da   : > { %2650 = vpow2.f32 %v1112_v29 }
 0x3db   : > { %2652 = vpow2.f32 %v1114_v32 }
 0x3dc   : > { %v1242_v33 = vpop.xlane.xlu0 %1241 }
 0x3dd   : > { %v1252_v34 = vsub.f32 %v1211_v59, %v1242_v33 }
 0x3df   : > { %v3164_v35 = vpop.eup %2648  ;;  %v1256_v36 = vmul.f32 1.442695, %v1252_v34 }
 0x3e0   : > { %v3166_v37 = vpop.eup %2650  ;;  %v1127_v39 = vsel %vm1093_vm1, %v3164_v35, 0.0 }
 0x3e1   : > { %2654 = vpow2.f32 %v1256_v36  ;;  %1128 = vadd.xlane.f32.xlu1 %v1127_v39  ;;  %v1121_v40 = vsel %vm1093_vm1, %v3166_v37, 0.0  ;;  %v3173_v44 = vpop.eup %2652 }
 0x3e2   : > { %1122 = vadd.xlane.f32.xlu2 %v1121_v40  ;;  %v1124_v48 = vsel %vm1093_vm1, %v3173_v44, 0.0 }
 0x3e4   : > { %v1245_v41 = vpop.xlane.xlu2 %1244  ;;  %v1248_v49 = vpop.xlane.xlu0 %1247 }
 0x3e5   : > { %v1253_v42 = vsub.f32 %v3115_v53, %v1245_v41  ;;  %v1254_v54 = vsub.f32 %v3113_v61, %v1248_v49 }
 0x3e7   : > { %v3175_v45 = vpop.eup %2654  ;;  %v1258_v46 = vmul.f32 1.442695, %v1253_v42  ;;  %v1260_v57 = vmul.f32 1.442695, %v1254_v54 }
 0x3e8   : > { %v1264_v47 = vsel %vm1093_vm1, %v3175_v45, 0.0 }
 0x3e9   : > { %2656 = vpow2.f32 %v1258_v46  ;;  %1265 = vadd.xlane.f32.xlu0 %v1264_v47 }
 0x3ea   : > { %1125 = vadd.xlane.f32.xlu2 %v1124_v48 }
 0x3ec   : > { %v1388_v50 = vpop.xlane.xlu2 %1387  ;;  %v3199_v62 = vpop.permute.xlu1 %1439 }
 0x3ed   : > { %v1398_v51 = vsub.f32 %v3123_v1, %v1388_v50 }
 0x3ef   : > { %v3182_v52 = vpop.eup %2656  ;;  %v1402_v55 = vmul.f32 1.442695, %v1398_v51 }
 0x3f0   : > { %v1267_v56 = vsel %vm1093_vm1, %v3182_v52, 0.0 }
 0x3f1   : > { %2658 = vpow2.f32 %v1402_v55  ;;  %v1394_v1 = vpop.xlane.xlu0 %1393 }
 0x3f2   : > { %1268 = vadd.xlane.f32.xlu2 %v1267_v56  ;;  %2660 = vpow2.f32 %v1260_v57 }
 0x3f4   : > { %v1251_v53 = vpop.xlane.xlu2 %1250 }
 0x3f5   : > { %v1255_v9 = vsub.f32 %v3121_v0, %v1251_v53 }
 0x3f7   : > { %v3187_v58 = vpop.eup %2658  ;;  %v1262_v15 = vmul.f32 1.442695, %v1255_v9 }
 0x3f8   : > { %v1410_v59 = vsel %vm1093_vm1, %v3187_v58, 0.0  ;;  %v3193_v60 = vpop.eup %2660 }
 0x3f9   : > { %1411 = vadd.xlane.f32.xlu0 %v1410_v59  ;;  %v1270_v61 = vsel %vm1093_vm1, %v3193_v60, 0.0 }
 0x3fa   : > { %1318 = vrot.lane.b32.xlu1 %v3077_v17, %s2813_s17 }
 0x3fc   : > { %v1397_v43 = vpop.xlane.xlu2 %1396 }
 0x3fd   : > { %v1401_v26 = vsub.f32 %v3137_v7, %v1397_v43 }
 0x3ff   : > { %v1408_v29 = vmul.f32 1.442695, %v1401_v26 }
 0x401   : > { %1271 = vadd.xlane.f32.xlu0 %v1270_v61 }
 0x402   : > { %1585 = vrot.lane.b32.xlu1 %v3073_v63, %s2815_s21 }
 0x404   : > { %v1537_v18 = vpop.xlane.xlu0 %1536 }
 0x405   : > { %v1545_v21 = vsub.f32 %v3145_v11, %v1537_v18 }
 0x409   : > { %v1543_v2 = vpop.xlane.xlu2 %1542 }
 0x40a   : > { %v1547_v12 = vsub.f32 %v3149_v13, %v1543_v2  ;;  %v1550_v13 = vmul.f32 1.442695, %v1545_v21 }
 0x40c   : > { %v1554_v16 = vmul.f32 1.442695, %v1547_v12  ;;  %v1540_v30 = vpop.xlane.xlu0 %1539 }
 0x40d   : > { %v1546_v7 = vsub.f32 %v3143_v10, %v1540_v30 }
 0x40f   : > { %v1552_v36 = vmul.f32 1.442695, %v1546_v7 }
 0x417   : > { %v1391_v4 = vpop.xlane.xlu1 %1390 }
 0x418   : > { %v1399_v6 = vsub.f32 %v3133_v5, %v1391_v4  ;;  %v1400_v5 = vsub.f32 %v3129_v3, %v1394_v1 }
 0x41a   : > { %v1404_v14 = vmul.f32 1.442695, %v1399_v6  ;;  %v1406_v24 = vmul.f32 1.442695, %v1400_v5 }
 0x41c   : > { %2662 = vpow2.f32 %v1404_v14 }
 0x41d   : > { %2664 = vpow2.f32 %v1262_v15 }
 0x41e   : > { %2666 = vpow2.f32 %v1554_v16 }
 0x41f   : > { %v1534_v19 = vpop.xlane.xlu1 %1533 }
 0x420   : > { %v1544_v63 = vsub.f32 %v3139_v8, %v1534_v19 }
 0x422   : > { %v3205_v20 = vpop.eup %2662  ;;  %v1548_v22 = vmul.f32 1.442695, %v1544_v63 }
 0x423   : > { %v1413_v0 = vsel %vm1093_vm1, %v3205_v20, 0.0  ;;  %v3211_v23 = vpop.eup %2664 }
 0x424   : > { %2668 = vpow2.f32 %v1548_v22  ;;  %1414 = vadd.xlane.f32.xlu2 %v1413_v0  ;;  %v3213_v25 = vpop.eup %2666  ;;  %v1273_v11 = vsel %vm1093_vm1, %v3211_v23, 0.0 }
 0x425   : > { %2670 = vpow2.f32 %v1550_v13  ;;  %v1565_v3 = vsel %vm1093_vm1, %v3213_v25, 0.0 }
 0x426   : > { %2672 = vpow2.f32 %v1406_v24 }
 0x427   : > { %2674 = vpow2.f32 %v1408_v29 }
 0x428   : > { %2676 = vpow2.f32 %v1552_v36 }
 0x42a   : > { %v3215_v8 = vpop.eup %2668 }
 0x42b   : > { %v1556_v28 = vsel %vm1093_vm1, %v3215_v8, 0.0  ;;  %v3224_v31 = vpop.eup %2670 }
 0x42c   : > { %1566 = vadd.xlane.f32.xlu1 %v1565_v3  ;;  %1274 = vadd.xlane.f32.xlu2 %v1273_v11  ;;  %v3226_v32 = vpop.eup %2672  ;;  %v1559_v33 = vsel %vm1093_vm1, %v3224_v31, 0.0 }
 0x42d   : > { %1557 = vadd.xlane.f32.xlu0 %v1556_v28  ;;  %v1416_v34 = vsel %vm1093_vm1, %v3226_v32, 0.0  ;;  %v3233_v39 = vpop.eup %2674 }
 0x42e   : > { %v1419_v40 = vsel %vm1093_vm1, %v3233_v39, 0.0  ;;  %v3237_v41 = vpop.eup %2676 }
 0x42f   : > { %v1562_v10 = vsel %vm1093_vm1, %v3237_v41, 0.0 }
 0x434   : > { %1560 = vadd.xlane.f32.xlu2 %v1559_v33 }
 0x435   : > { %1417 = vadd.xlane.f32.xlu0 %v1416_v34 }
 0x43c   : > { %1420 = vadd.xlane.f32.xlu2 %v1419_v40 }
 0x444   : > { %1563 = vadd.xlane.f32.xlu2 %v1562_v10 }
 0x449   : > { %1464 = vrot.lane.b32.xlu0 %v3077_v17, %s2814_s25 }
 0x44c   : > { %v1120_v42 = vpop.xlane.xlu0 %1119 }
 0x44d   : > { %2678 = vrcp.f32 %v1120_v42 }
 0x453   : > { %v2679_v48 = vpop.eup %2678 }
 0x454   : > { %v1129_v46 = vpop.xlane.xlu1 %1128  ;;  %v1134_v49 = vmul.f32 %v2679_v48, %v3159_v27 }
 0x455   : > { %v1123_v47 = vpop.xlane.xlu2 %1122 }
 0x456   : > { %2680 = vrcp.f32 %v1123_v47  ;;  %v1138_v51 = vpack.c.bf16 %v1134_v49, %v1134_v49 }
 0x457   : > { %2682 = vrcp.f32 %v1129_v46 }
 0x458   : > { %v1144_v59 = vunpack.c.l.b16 %v1138_v51 }
 0x45c   : > { %v2681_v50 = vpop.eup %2680  ;;  %1610 = vrot.lane.b32.xlu2 %v3077_v17, %s2815_s21  ;;  %v1266_v2 = vpop.xlane.xlu0 %1265  ;;  %s3519_s21 = scalar_lea.vmem %s3488_s15, %s2939_s19 }
 0x45d   : > { %v1135_v54 = vmul.f32 %v2681_v50, %v3166_v37  ;;  %v1126_v55 = vpop.xlane.xlu2 %1125  ;;  %v2683_v56 = vpop.eup %2682 }
 0x45e   : > { %2684 = vrcp.f32 %v1126_v55  ;;  %v1137_v53 = vmul.f32 %v2683_v56, %v3164_v35 }
 0x45f   : > { %v1139_v57 = vpack.c.bf16 %v1135_v54, %v1135_v54 }
 0x460   : > { %v1141_v17 = vpack.c.bf16 %v1137_v53, %v1137_v53 }
 0x461   : > { %v1145_v61 = vunpack.c.l.b16 %v1139_v57 }
 0x462   : > { %v1170_v9 = vunpack.c.l.b16 %v1141_v17 }
 0x463   : > { %v1146_v43 = vpack.c.b16 %v1145_v61, %v1144_v59 }
 0x464   : > { %v2685_v1 = vpop.eup %2684 }
 0x465   : > { %v1269_v4 = vpop.xlane.xlu2 %1268  ;;  %2473 = vmatmul.msk.bf16.vlgmr.msrb.gmra.mxu0 %vm1093_vm1, %v1146_v43  ;;  %v1136_v27 = vmul.f32 %v2685_v1, %v3173_v44 }
 0x466   : > { %2686 = vrcp.f32 %v1269_v4 }
 0x467   : > { %v1140_v6 = vpack.c.bf16 %v1136_v27, %v1136_v27  ;;  %2688 = vrcp.f32 %v1266_v2 }
 0x469   : > { %v1169_v37 = vunpack.c.l.b16 %v1140_v6 }
 0x46b   : > { %v1171_v12 = vpack.c.b16 %v1170_v9, %v1169_v37 }
 0x46c   : > { %v2687_v14 = vpop.eup %2686  ;;  %v1319_v15 = vpop.permute.xlu1 %1318 }
 0x46d   : > { %2474 = vmatmul.msk.bf16.vlgmr.msra.gmra.mxu3 %vm1093_vm1, %v1171_v12  ;;  %1331 = vmatpush.bf16.msra.mxu0 %v1319_v15  ;;  %v2689_v35 = vpop.eup %2688  ;;  %v1281_v16 = vmul.f32 %v2687_v14, %v3182_v52  ;;  %v1412_v0 = vpop.xlane.xlu0 %1411 }
 0x46e   : > { %1452 = vmatpush.bf16.msra.mxu3 %v3199_v62  ;;  %v1280_v18 = vmul.f32 %v2689_v35, %v3175_v45  ;;  %2690 = vrcp.f32 %v1412_v0 }
 0x46f   : > { %v1285_v44 = vpack.c.bf16 %v1281_v16, %v1281_v16 }
 0x470   : > { %v1284_v19 = vpack.c.bf16 %v1280_v18, %v1280_v18 }
 0x471   : > { %v1291_v63 = vunpack.c.l.b16 %v1285_v44 }
 0x472   : > { %v1290_v21 = vunpack.c.l.b16 %v1284_v19 }
 0x474   : > { %v1292_v22 = vpack.c.b16 %v1291_v63, %v1290_v21  ;;  %v1586_v5 = vpop.permute.xlu1 %1585  ;;  %v2691_v24 = vpop.eup %2690 }
 0x475   : > { %v1272_v26 = vpop.xlane.xlu0 %1271  ;;  %v1426_v62 = vmul.f32 %v2691_v24, %v3187_v58 }
 0x477   : > { %v1430_v45 = vpack.c.bf16 %v1426_v62, %v1426_v62 }
 0x479   : > { %v1436_v7 = vunpack.c.l.b16 %v1430_v45 }
 0x47d   : > { %2477 = vmatmul.msk.bf16.vlgmr.msrb.gmra.mxu3 %vm1093_vm1, %v1292_v22 }
 0x47e   : > { %1598 = vmatpush.bf16.msrb.mxu3 %v1586_v5 }
 0x497   : > { %v1415_v13 = vpop.xlane.xlu2 %1414 }
 0x498   : > { %2692 = vrcp.f32 %v1415_v13 }
 0x499   : > { %2694 = vrcp.f32 %v1272_v26 }
 0x49e   : > { %v2693_v52 = vpop.eup %2692 }
 0x49f   : > { %v1427_v3 = vmul.f32 %v2693_v52, %v3205_v20  ;;  %v1275_v11 = vpop.xlane.xlu2 %1274  ;;  %v2695_v29 = vpop.eup %2694 }
 0x4a0   : > { %v1558_v28 = vpop.xlane.xlu0 %1557  ;;  %2696 = vrcp.f32 %v1275_v11  ;;  %v1282_v34 = vmul.f32 %v2695_v29, %v3193_v60  ;;  %v1567_v27 = vpop.xlane.xlu1 %1566 }
 0x4a1   : > { %v1431_v30 = vpack.c.bf16 %v1427_v3, %v1427_v3  ;;  %2698 = vrcp.f32 %v1558_v28 }
 0x4a2   : > { %v1286_v42 = vpack.c.bf16 %v1282_v34, %v1282_v34 }
 0x4a3   : > { %v1437_v33 = vunpack.c.l.b16 %v1431_v30 }
 0x4a4   : > { %v1315_v49 = vunpack.c.l.b16 %v1286_v42 }
 0x4a5   : > { %v1438_v36 = vpack.c.b16 %v1437_v33, %v1436_v7 }
 0x4a6   : > { %v2697_v40 = vpop.eup %2696 }
 0x4a7   : > { %v1561_v10 = vpop.xlane.xlu2 %1560  ;;  %2481 = vmatmul.msk.bf16.vlgmr.msra.gmra.mxu3 %vm1093_vm1, %v1438_v36  ;;  %v2699_v58 = vpop.eup %2698  ;;  %v1283_v46 = vmul.f32 %v2697_v40, %v3211_v23  ;;  %v2540_v40 = vld [vmem:[%s3517_s0 + $0x8] sm:$0xff] }
 0x4a8   : > { %2700 = vrcp.f32 %v1561_v10  ;;  %v1418_v20 = vpop.xlane.xlu0 %1417  ;;  %v1572_v48 = vmul.f32 %v2699_v58, %v3215_v8  ;;  %1721 = vmatpush.bf16.msra.mxu1 %v2540_v40  ;;  %v2539_v10 = vld [vmem:[%s3517_s0] sm:$0xff] }
 0x4a9   : > { %v1287_v47 = vpack.c.bf16 %v1283_v46, %v1283_v46  ;;  %2702 = vrcp.f32 %v1418_v20 }
 0x4aa   : > { %v1576_v60 = vpack.c.bf16 %v1572_v48, %v1572_v48 }
 0x4ab   : > { %v1316_v50 = vunpack.c.l.b16 %v1287_v47 }
 0x4ac   : > { %v1582_v23 = vunpack.c.l.b16 %v1576_v60  ;;  %1722 = vmatpush.bf16.msra.mxu1 %v2539_v10 }
 0x4ad   : > { %v1317_v54 = vpack.c.b16 %v1316_v50, %v1315_v49 }
 0x4ae   : > { %v2701_v51 = vpop.eup %2700 }
 0x4af   : > { %v1573_v55 = vmul.f32 %v2701_v51, %v3224_v31  ;;  %v1421_v56 = vpop.xlane.xlu2 %1420  ;;  %v2703_v57 = vpop.eup %2702  ;;  %2478 = vmatmul.msk.bf16.vlgmr.msra.gmra.mxu0 %vm1093_vm1, %v1317_v54 }
 0x4b0   : > { %2704 = vrcp.f32 %v1421_v56  ;;  %v1428_v53 = vmul.f32 %v2703_v57, %v3226_v32 }
 0x4b1   : > { %v1577_v59 = vpack.c.bf16 %v1573_v55, %v1573_v55 }
 0x4b2   : > { %v1432_v8 = vpack.c.bf16 %v1428_v53, %v1428_v53 }
 0x4b3   : > { %v1583_v61 = vunpack.c.l.b16 %v1577_v59 }
 0x4b4   : > { %v1461_v17 = vunpack.c.l.b16 %v1432_v8 }
 0x4b5   : > { %v1584_v43 = vpack.c.b16 %v1583_v61, %v1582_v23 }
 0x4b6   : > { %v2705_v1 = vpop.eup %2704 }
 0x4b7   : > { %v1429_v2 = vmul.f32 %v2705_v1, %v3233_v39  ;;  %v1564_v4 = vpop.xlane.xlu2 %1563  ;;  %2485 = vmatmul.msk.bf16.vlgmr.msrb.gmra.mxu3 %vm1093_vm1, %v1584_v43 }
 0x4b8   : > { %2706 = vrcp.f32 %v1564_v4 }
 0x4b9   : > { %v1433_v31 = vpack.c.bf16 %v1429_v2, %v1429_v2  ;;  %2708 = vrcp.f32 %v1567_v27 }
 0x4bb   : > { %v1462_v6 = vunpack.c.l.b16 %v1433_v31  ;;  %v1465_v37 = vpop.permute.xlu0 %1464 }
 0x4bc   : > { %1477 = vmatpush.bf16.msrb.mxu0 %v1465_v37 }
 0x4bd   : > { %v1463_v9 = vpack.c.b16 %v1462_v6, %v1461_v17 }
 0x4be   : > { %v2707_v12 = vpop.eup %2706 }
 0x4bf   : > { %v1611_v14 = vpop.permute.xlu2 %1610  ;;  %2482 = vmatmul.msk.bf16.vlgmr.msrb.gmra.mxu0 %vm1093_vm1, %v1463_v9  ;;  %v2709_v32 = vpop.eup %2708  ;;  %v1574_v39 = vmul.f32 %v2707_v12, %v3237_v41 }
 0x4c0   : > { %1623 = vmatpush.bf16.msra.mxu0 %v1611_v14  ;;  %v1575_v15 = vmul.f32 %v2709_v32, %v3213_v25 }
 0x4c1   : > { %v1578_v35 = vpack.c.bf16 %v1574_v39, %v1574_v39  ;;  %v2631_v39 = vld [vmem:[%s3518_s28] ss:$0 sm:$0xff] }
 0x4c2   : > { %v1579_v16 = vpack.c.bf16 %v1575_v15, %v1575_v15 }
 0x4c3   : > { %v1607_v18 = vunpack.c.l.b16 %v1578_v35  ;;  %v2734_v35 = vld [vmem:[#allocation2] sm:$0xff] }
 0x4c4   : > { %v1608_v44 = vunpack.c.l.b16 %v1579_v16 }
 0x4c6   : > { %v1609_v19 = vpack.c.b16 %v1608_v44, %v1607_v18 }
 0x4cf   : > { %2486 = vmatmul.msk.bf16.vlgmr.msra.gmra.mxu0 %vm1093_vm1, %v1609_v19 }
 0x4e2   : > { %v1162_v13 = vpop.f32.mrf.mxu0 }
 0x4ea   : > { %v1164_v24 = vpop.f32.mrf.mxu0 }
 0x4f0   : > { %v1187_v63 = vpop.f32.mrf.mxu3 }
 0x4f8   : > { %v1189_v21 = vpop.f32.mrf.mxu3 }
 0x500   : > { %v1308_v22 = vpop.f32.mrf.mxu3 }
 0x508   : > { %v1310_v5 = vpop.f32.mrf.mxu3 }
 0x509   : > { %v2598_v0 = vpack.i.bf16 %v1310_v5, %v1308_v22 }
 0x50b   : > { %2599 = vrot.lane.b32.xlu0 %v2598_v0, %s2816_s2 }
 0x52a   : > { %v1454_v41 = vpop.f32.mrf.mxu3 }
 0x52c   : > { %v1333_v26 = vpop.f32.mrf.mxu0 }
 0x532   : > { %v1456_v25 = vpop.f32.mrf.mxu3 }
 0x533   : > { %v2603_v62 = vpack.i.bf16 %v1456_v25, %v1454_v41 }
 0x534   : > { %v1335_v52 = vpop.f32.mrf.mxu0 }
 0x535   : > { %2604 = vrot.lane.b32.xlu0 %v2603_v62, %s2817_s26  ;;  %v2613_v3 = vpack.i.bf16 %v1335_v52, %v1333_v26  ;;  %v2737_v62 = vld [vmem:[#allocation2 + $0x18] sm:$0xff] }
 0x53a   : > { %v1600_v45 = vpop.f32.mrf.mxu3 }
 0x53c   : > { %v1479_v11 = vpop.f32.mrf.mxu0 }
 0x53d   : > { %2614 = vrot.lane.b32.xlu0 %v2613_v3, %s2816_s2 }
 0x542   : > { %v1602_v28 = vpop.f32.mrf.mxu3 }
 0x543   : > { %v2608_v29 = vpack.i.bf16 %v1602_v28, %v1600_v45 }
 0x544   : > { %v1481_v30 = vpop.f32.mrf.mxu0 }
 0x545   : > { %2609 = vrot.lane.b32.xlu2 %v2608_v29, %s2818_s24  ;;  %v2618_v7 = vpack.i.bf16 %v1481_v30, %v1479_v11 }
 0x54c   : > { %v1625_v33 = vpop.f32.mrf.mxu0 }
 0x54d   : > { %2619 = vrot.lane.b32.xlu2 %v2618_v7, %s2817_s26  ;;  %s3520_s26 = sld [smem:[#allocation15_spill]] (!%p2525_p6) }
 0x554   : > { %v1627_v34 = vpop.f32.mrf.mxu0 }
 0x555   : > { %v2623_v36 = vpack.i.bf16 %v1627_v34, %v1625_v33 }
 0x557   : > { %2624 = vrot.lane.b32.xlu0 %v2623_v36, %s2818_s24 }
 0x57d   : > { %v2600_v58 = vpop.permute.xlu0 %2599 }
 0x57e   : > { %v2602_v42 = vunpack.i.h.bf16 %v2600_v58  ;;  %v2601_v46 = vunpack.i.l.bf16 %v2600_v58 }
 0x580   : > { %v1679_v50 = vsel %vm1040_vm0, %v1164_v24, %v2602_v42  ;;  %v1678_v51 = vsel %vm1040_vm0, %v1162_v13, %v2601_v46  ;;  %v2736_v13 = vld [vmem:[#allocation2 + $0x10] sm:$0xff] }
 0x59f   : > { %v2610_v20 = vpop.permute.xlu2 %2609 }
 0x5a0   : > { %v2612_v54 = vunpack.i.h.bf16 %v2610_v20  ;;  %v2611_v60 = vunpack.i.l.bf16 %v2610_v20 }
 0x5a7   : > { %v2605_v47 = vpop.permute.xlu0 %2604  ;;  %v2620_v1 = vpop.permute.xlu2 %2619 }
 0x5a8   : > { %v2607_v48 = vunpack.i.h.bf16 %v2605_v47  ;;  %v2606_v49 = vunpack.i.l.bf16 %v2605_v47  ;;  %v2622_v4 = vunpack.i.h.bf16 %v2620_v1  ;;  %v2621_v27 = vunpack.i.l.bf16 %v2620_v1 }
 0x5aa   : > { %v1682_v55 = vsel %vm1093_vm1, %v1678_v51, %v2606_v49  ;;  %v1683_v56 = vsel %vm1093_vm1, %v1679_v50, %v2607_v48 }
 0x5ab   : > { %v1687_v57 = vsel %vm1686_vm3, %v1682_v55, %v2611_v60  ;;  %v1688_v59 = vsel %vm1686_vm3, %v1683_v56, %v2612_v54  ;;  %v2542_v55 = vld [vmem:[%s2979_s6 + $0x8] sm:$0xff] }
 0x5ac   : > { %v1695_v23 = vpack.c.bf16 %v1688_v59, %v1687_v57  ;;  %1884 = vmatpush.bf16.msra.mxu2 %v2542_v55  ;;  %v2541_v59 = vld [vmem:[%s2979_s6] sm:$0xff] }
 0x5ad   : > { %v3354_v55 = vld [vmem:[%s767_s8] ss:$0 sm:$0xff] }
 0x5ae   : > { %2495 = vmatmul.msk.bf16.vlgmr.msra.gmra.mxu1 %vm859_vm2, %v1695_v23 }
 0x5af   : > { %v2615_v61 = vpop.permute.xlu0 %2614 }
 0x5b0   : > { %v2617_v53 = vunpack.i.h.bf16 %v2615_v61  ;;  %v2616_v43 = vunpack.i.l.bf16 %v2615_v61  ;;  %1885 = vmatpush.bf16.msra.mxu2 %v2541_v59 }
 0x5b2   : > { %v1681_v8 = vsel %vm1040_vm0, %v1189_v21, %v2617_v53  ;;  %v1680_v2 = vsel %vm1040_vm0, %v1187_v63, %v2616_v43  ;;  %v2735_v63 = vld [vmem:[#allocation2 + $0x8] sm:$0xff] }
 0x5b3   : > { %v1684_v37 = vsel %vm1093_vm1, %v1680_v2, %v2621_v27  ;;  %v1685_v9 = vsel %vm1093_vm1, %v1681_v8, %v2622_v4 }
 0x5c9   : > { %v2625_v31 = vpop.permute.xlu0 %2624 }
 0x5ca   : > { %v2627_v17 = vunpack.i.h.bf16 %v2625_v31  ;;  %v2626_v6 = vunpack.i.l.bf16 %v2625_v31 }
 0x5cc   : > { %v1689_v12 = vsel %vm1686_vm3, %v1684_v37, %v2626_v6  ;;  %v1690_v14 = vsel %vm1686_vm3, %v1685_v9, %v2627_v17 }
 0x5cd   : > { %v1696_v32 = vpack.c.bf16 %v1690_v14, %v1689_v12  ;;  %v2632_v14 = vld [vmem:[%s756_s16] ss:$0 sm:$0xff] }
 0x5cf   : > { %2496 = vmatmul.msk.bf16.gmra.mxu1 %vm859_vm2, %v1696_v32 }
 0x62b   : > { %v1724_v15 = vpop.f32.mrf.mxu1 }
 0x62c   : > { %v1734_v16 = vadd.f32 %v2734_v35, %v1724_v15  ;;  %v2633_v35 = vld [vmem:[%s759_s30] ss:$0 sm:$0xff] }
 0x62e   : > { %v3293_v18 = vadd.f32 %v2631_v39, %v1734_v16 }
 0x630   : > { %v1748_v44 = vsel %vm859_vm2, %v3293_v18, 0.0 }
 0x631   : > { %1749 = vadd.xlane.f32.xlu1 %v1748_v44 }
 0x633   : > { %v1726_v19 = vpop.f32.mrf.mxu1 }
 0x634   : > { %v1735_v21 = vadd.f32 %v2735_v63, %v1726_v19 }
 0x636   : > { %v3297_v22 = vadd.f32 %v2631_v39, %v1735_v21 }
 0x638   : > { %v1751_v5 = vsel %vm859_vm2, %v3297_v22, 0.0 }
 0x639   : > { %1752 = vadd.xlane.f32.xlu2 %v1751_v5 }
 0x64c   : > { %v1729_v0 = vpop.f32.mrf.mxu1 }
 0x64d   : > { %v1736_v24 = vadd.f32 %v2736_v13, %v1729_v0 }
 0x64f   : > { %v3301_v41 = vadd.f32 %v2631_v39, %v1736_v24 }
 0x651   : > { %v1754_v26 = vsel %vm859_vm2, %v3301_v41, 0.0 }
 0x652   : > { %1755 = vadd.xlane.f32.xlu0 %v1754_v26 }
 0x654   : > { %v1731_v25 = vpop.f32.mrf.mxu1 }
 0x655   : > { %v1737_v52 = vadd.f32 %v2737_v62, %v1731_v25 }
 0x657   : > { %v3305_v45 = vadd.f32 %v2631_v39, %v1737_v52 }
 0x659   : > { %v1757_v3 = vsel %vm859_vm2, %v3305_v45, 0.0 }
 0x65a   : > { %1758 = vadd.xlane.f32.xlu1 %v1757_v3 }
 0x6a4   : > { %v1750_v11 = vpop.xlane.xlu1 %1749 }
 0x6a5   : > { %v1760_v28 = vmul.f32 %v1750_v11, %v3030_v38 }
 0x6a7   : > { %v1764_v29 = vsub.f32 %v3293_v18, %v1760_v28 }
 0x6a9   : > { %v1768_v30 = vmul.f32 %v1764_v29, %v1764_v29 }
 0x6ab   : > { %v1772_v7 = vsel %vm859_vm2, %v1768_v30, 0.0 }
 0x6ac   : > { %v1753_v33 = vpop.xlane.xlu2 %1752  ;;  %1773 = vadd.xlane.f32.xlu1 %v1772_v7 }
 0x6ad   : > { %v1761_v34 = vmul.f32 %v1753_v33, %v3030_v38 }
 0x6af   : > { %v1765_v36 = vsub.f32 %v3297_v22, %v1761_v34 }
 0x6b1   : > { %v1769_v40 = vmul.f32 %v1765_v36, %v1765_v36 }
 0x6b3   : > { %v1775_v10 = vsel %vm859_vm2, %v1769_v40, 0.0 }
 0x6b4   : > { %1776 = vadd.xlane.f32.xlu1 %v1775_v10 }
 0x6c5   : > { %v1756_v58 = vpop.xlane.xlu0 %1755 }
 0x6c6   : > { %v1762_v42 = vmul.f32 %v1756_v58, %v3030_v38 }
 0x6c8   : > { %v3317_v46 = vsub.f32 %v3301_v41, %v1762_v42 }
 0x6ca   : > { %v1770_v20 = vmul.f32 %v3317_v46, %v3317_v46 }
 0x6cc   : > { %v1778_v47 = vsel %vm859_vm2, %v1770_v20, 0.0 }
 0x6cd   : > { %1779 = vadd.xlane.f32.xlu1 %v1778_v47  ;;  %v1759_v48 = vpop.xlane.xlu1 %1758 }
 0x6ce   : > { %v1763_v49 = vmul.f32 %v1759_v48, %v3030_v38 }
 0x6d0   : > { %v3324_v50 = vsub.f32 %v3305_v45, %v1763_v49 }
 0x6d2   : > { %v1771_v51 = vmul.f32 %v3324_v50, %v3324_v50 }
 0x6d4   : > { %v1781_v54 = vsel %vm859_vm2, %v1771_v51, 0.0 }
 0x6d5   : > { %1782 = vadd.xlane.f32.xlu1 %v1781_v54 }
 0x71f   : > { %v1774_v60 = vpop.xlane.xlu1 %1773 }
 0x720   : > { %v1784_v56 = vmul.f32 %v1774_v60, %v3030_v38 }
 0x722   : > { %v1788_v57 = vadd.f32 1e-06, %v1784_v56 }
 0x724   : > { %2710 = vrsqrt.f32 %v1788_v57  ;;  %vm1798_vm5 = vweird.f32 %v1788_v57 }
 0x727   : > { %v1777_v23 = vpop.xlane.xlu1 %1776 }
 0x728   : > { %v1785_v61 = vmul.f32 %v1777_v23, %v3030_v38 }
 0x72a   : > { %v2711_v53 = vpop.eup %2710  ;;  %v1789_v43 = vadd.f32 1e-06, %v1785_v61 }
 0x72b   : > { %v1793_v1 = vmul.f32 %v2711_v53, %v1788_v57  ;;  %vm1799_vm4 = vweird.f32 %v2711_v53 }
 0x72c   : > { %2712 = vrsqrt.f32 %v1789_v43  ;;  %vm1800_vm6 = vmor %vm1798_vm5, %vm1799_vm4  ;;  %vm1808_vm8 = vweird.f32 %v1789_v43 }
 0x72d   : > { %v1794_v8 = vmul.f32 %v2711_v53, %v1793_v1 }
 0x72f   : > { %v1795_v2 = vmul.f32 0.5, %v1794_v8 }
 0x731   : > { %v1796_v4 = vsub.f32 1.5, %v1795_v2 }
 0x732   : > { %v2713_v27 = vpop.eup %2712 }
 0x733   : > { %v1797_v31 = vmul.f32 %v2711_v53, %v1796_v4  ;;  %v1803_v17 = vmul.f32 %v2713_v27, %v1789_v43  ;;  %vm1809_vm7 = vweird.f32 %v2713_v27 }
 0x734   : > { %vm1810_vm9 = vmor %vm1808_vm8, %vm1809_vm7 }
 0x735   : > { %v1804_v6 = vmul.f32 %v2713_v27, %v1803_v17  ;;  %v1801_v37 = vsel %vm1800_vm6, %v2711_v53, %v1797_v31 }
 0x736   : > { %v1832_v32 = vmul.f32 %v1801_v37, %v1764_v29 }
 0x737   : > { %v1805_v9 = vmul.f32 0.5, %v1804_v6 }
 0x738   : > { %v1839_v16 = vmul.f32 %v2632_v14, %v1832_v32 }
 0x739   : > { %v1806_v12 = vsub.f32 1.5, %v1805_v9  ;;  %v2546_v9 = vld [vmem:[%s2989_s22 + $0x18] sm:$0xff] }
 0x73a   : > { %v1846_v21 = vadd.f32 %v2633_v35, %v1839_v16  ;;  %2102 = vmatpush.bf16.msra.mxu3 %v2546_v9 }
 0x73b   : > { %v1807_v39 = vmul.f32 %v2713_v27, %v1806_v12 }
 0x73d   : > { %v1811_v15 = vsel %vm1810_vm9, %v2713_v27, %v1807_v39 }
 0x73e   : > { %v1833_v44 = vmul.f32 %v1811_v15, %v1765_v36  ;;  %v2545_v15 = vld [vmem:[%s2989_s22 + $0x10] sm:$0xff] }
 0x73f   : > { %2103 = vmatpush.bf16.msra.mxu3 %v2545_v15 }
 0x740   : > { %v1840_v19 = vmul.f32 %v2632_v14, %v1833_v44  ;;  %v1780_v63 = vpop.xlane.xlu1 %1779 }
 0x741   : > { %v1786_v0 = vmul.f32 %v1780_v63, %v3030_v38 }
 0x742   : > { %v1847_v5 = vadd.f32 %v2633_v35, %v1840_v19 }
 0x743   : > { %v1790_v13 = vadd.f32 1e-06, %v1786_v0  ;;  %v2544_v0 = vld [vmem:[%s2989_s22 + $0x8] sm:$0xff] }
 0x744   : > { %v1854_v24 = vpack.c.bf16 %v1847_v5, %v1846_v21  ;;  %2104 = vmatpush.bf16.msra.mxu3 %v2544_v0 }
 0x745   : > { %2714 = vrsqrt.f32 %v1790_v13  ;;  %vm1818_vm11 = vweird.f32 %v1790_v13 }
 0x746   : > { %2505 = vmatmul.msk.bf16.vlgmr.msra.gmra.mxu2 %vm859_vm2, %v1854_v24 }
 0x748   : > { %v1783_v26 = vpop.xlane.xlu1 %1782 }
 0x749   : > { %v1787_v25 = vmul.f32 %v1783_v26, %v3030_v38 }
 0x74b   : > { %v2715_v62 = vpop.eup %2714  ;;  %v1791_v52 = vadd.f32 1e-06, %v1787_v25 }
 0x74c   : > { %v1813_v3 = vmul.f32 %v2715_v62, %v1790_v13  ;;  %vm1819_vm10 = vweird.f32 %v2715_v62 }
 0x74d   : > { %2716 = vrsqrt.f32 %v1791_v52  ;;  %vm1820_vm12 = vmor %vm1818_vm11, %vm1819_vm10  ;;  %vm1828_vm14 = vweird.f32 %v1791_v52 }
 0x74e   : > { %v1814_v11 = vmul.f32 %v2715_v62, %v1813_v3 }
 0x750   : > { %v1815_v28 = vmul.f32 0.5, %v1814_v11 }
 0x752   : > { %v1816_v29 = vsub.f32 1.5, %v1815_v28  ;;  %v2543_v28 = vld [vmem:[%s2989_s22] sm:$0xff] }
 0x753   : > { %v2717_v30 = vpop.eup %2716  ;;  %2105 = vmatpush.bf16.msra.mxu3 %v2543_v28 }
 0x754   : > { %v1817_v7 = vmul.f32 %v2715_v62, %v1816_v29  ;;  %v1823_v33 = vmul.f32 %v2717_v30, %v1791_v52  ;;  %vm1829_vm13 = vweird.f32 %v2717_v30 }
 0x755   : > { %vm1830_vm15 = vmor %vm1828_vm14, %vm1829_vm13 }
 0x756   : > { %v1824_v34 = vmul.f32 %v2717_v30, %v1823_v33  ;;  %v1821_v36 = vsel %vm1820_vm12, %v2715_v62, %v1817_v7 }
 0x757   : > { %v1834_v58 = vmul.f32 %v1821_v36, %v3317_v46 }
 0x758   : > { %v1825_v40 = vmul.f32 0.5, %v1824_v34 }
 0x759   : > { %v1841_v48 = vmul.f32 %v2632_v14, %v1834_v58 }
 0x75a   : > { %v1826_v10 = vsub.f32 1.5, %v1825_v40 }
 0x75b   : > { %v1848_v51 = vadd.f32 %v2633_v35, %v1841_v48 }
 0x75c   : > { %v1827_v42 = vmul.f32 %v2717_v30, %v1826_v10 }
 0x75e   : > { %v1831_v20 = vsel %vm1830_vm15, %v2717_v30, %v1827_v42  ;;  %vm2091_vm15 = vcmask 523264  }
 0x75f   : > { %v1835_v47 = vmul.f32 %v1831_v20, %v3324_v50 }
 0x761   : > { %v1842_v49 = vmul.f32 %v2632_v14, %v1835_v47 }
 0x763   : > { %v1849_v54 = vadd.f32 %v2633_v35, %v1842_v49 }
 0x765   : > { %v1855_v60 = vpack.c.bf16 %v1849_v54, %v1848_v51 }
 0x767   : > { %2506 = vmatmul.msk.bf16.gmra.mxu2 %vm859_vm2, %v1855_v60 }
 0x7c9   : > { %v1887_v46 = vpop.f32.mrf.mxu2 }
 0x7ca   : > { %v3357_v56 = vadd.f32 %v3354_v55, %v1887_v46 }
 0x7cc   : > { %v3360_v57 = vmul.f32 0.70710677, %v3357_v56 }
 0x7ce   : > { %v1905_v50 = vand.u32 2147483647, %v3360_v57  ;;  %vm2037_vm9 = vcmp.ge.f32.partialorder %v3360_v57, 0.0 }
 0x7d0   : > { %v1909_v59 = vmul.f32 0.3275911, %v1905_v50  ;;  %v2013_v16 = vsub.f32 0.0, %v1905_v50 }
 0x7d1   : > { %v1889_v23 = vpop.f32.mrf.mxu2 }
 0x7d2   : > { %v1913_v61 = vadd.f32 1.0, %v1909_v59  ;;  %v3364_v53 = vadd.f32 %v3354_v55, %v1889_v23  ;;  %v2017_v13 = vmul.f32 %v2013_v16, %v1905_v50 }
 0x7d4   : > { %2718 = vrcp.f32 %v1913_v61  ;;  %v3367_v43 = vmul.f32 0.70710677, %v3364_v53  ;;  %v1928_v17 = vand.u32 2147483648, %v1913_v61  ;;  %v1926_v37 = vand.u32 2147483647, %v1913_v61 }
 0x7d5   : > { %vm1922_vm1 = vweird.f32 %v1913_v61  ;;  %v2021_v29 = vmul.f32 1.442695, %v2017_v13  ;;  %v1898_v28 = vmul.f32 0.5, %v3364_v53 }
 0x7d6   : > { %v1906_v1 = vand.u32 2147483647, %v3367_v43  ;;  %v1929_v14 = vor.u32 1.1754944e-38, %v1928_v17  ;;  %vm1927_vm4 = vcmp.eq.f32.partialorder %v1926_v37, 8.507059e+37  ;;  %vm2038_vm13 = vcmp.ge.f32.partialorder %v3367_v43, 0.0 }
 0x7d8   : > { %v1910_v8 = vmul.f32 0.3275911, %v1906_v1  ;;  %v2014_v36 = vsub.f32 0.0, %v1906_v1 }
 0x7da   : > { %v2719_v2 = vpop.eup %2718  ;;  %v1914_v27 = vadd.f32 1.0, %v1910_v8  ;;  %v2018_v48 = vmul.f32 %v2014_v36, %v1906_v1 }
 0x7db   : > { %v1918_v4 = vmul.f32 %v2719_v2, %v1913_v61  ;;  %vm1923_vm0 = vweird.f32 %v2719_v2 }
 0x7dc   : > { %2720 = vrcp.f32 %v1914_v27  ;;  %vm1924_vm3 = vmor %vm1922_vm1, %vm1923_vm0  ;;  %v1943_v5 = vand.u32 2147483648, %v1914_v27  ;;  %v1941_v26 = vand.u32 2147483647, %v1914_v27  ;;  %vm1937_vm6 = vweird.f32 %v1914_v27 }
 0x7dd   : > { %v1919_v31 = vsub.f32 1.0, %v1918_v4  ;;  %2722 = vpow2.f32 %v2021_v29  ;;  %v2023_v61 = vmul.f32 1.442695, %v2018_v48 }
 0x7de   : > { %v1944_v3 = vor.u32 1.1754944e-38, %v1943_v5  ;;  %vm1942_vm8 = vcmp.eq.f32.partialorder %v1941_v26, 8.507059e+37 }
 0x7df   : > { %v1920_v6 = vmul.f32 %v2719_v2, %v1919_v31 }
 0x7e1   : > { %v1921_v12 = vadd.f32 %v2719_v2, %v1920_v6 }
 0x7e2   : > { %v2721_v32 = vpop.eup %2720 }
 0x7e3   : > { %v1925_v39 = vsel %vm1924_vm3, %v2719_v2, %v1921_v12  ;;  %v1933_v44 = vmul.f32 %v2721_v32, %v1914_v27  ;;  %vm1938_vm5 = vweird.f32 %v2721_v32  ;;  %v2723_v8 = vpop.eup %2722 }
 0x7e4   : > { %v1930_v35 = vsel %vm1927_vm4, %v1929_v14, %v1925_v39  ;;  %vm1939_vm7 = vmor %vm1937_vm6, %vm1938_vm5 }
 0x7e5   : > { %v1977_v19 = vmul.f32 1.0614054, %v1930_v35  ;;  %v1934_v63 = vsub.f32 1.0, %v1933_v44 }
 0x7e7   : > { %v1981_v21 = vadd.f32 -1.4531521, %v1977_v19  ;;  %v1935_v24 = vmul.f32 %v2721_v32, %v1934_v63 }
 0x7e9   : > { %v1985_v25 = vmul.f32 %v1981_v21, %v1930_v35  ;;  %v1936_v62 = vadd.f32 %v2721_v32, %v1935_v24 }
 0x7ea   : > { %v1892_v11 = vpop.f32.mrf.mxu2 }
 0x7eb   : > { %v1989_v52 = vadd.f32 1.4214138, %v1985_v25  ;;  %v1940_v30 = vsel %vm1939_vm7, %v2721_v32, %v1936_v62  ;;  %v3375_v7 = vadd.f32 %v3354_v55, %v1892_v11 }
 0x7ec   : > { %v1945_v34 = vsel %vm1942_vm8, %v1944_v3, %v1940_v30 }
 0x7ed   : > { %v1993_v33 = vmul.f32 %v1989_v52, %v1930_v35  ;;  %v1978_v40 = vmul.f32 1.0614054, %v1945_v34  ;;  %v3378_v10 = vmul.f32 0.70710677, %v3375_v7  ;;  %v1897_v52 = vmul.f32 0.5, %v3357_v56 }
 0x7ef   : > { %v1997_v58 = vadd.f32 -0.28449672, %v1993_v33  ;;  %v1982_v42 = vadd.f32 -1.4531521, %v1978_v40  ;;  %v1907_v20 = vand.u32 2147483647, %v3378_v10 }
 0x7f0   : > { %vm2039_vm5 = vcmp.ge.f32.partialorder %v3378_v10, 0.0  ;;  %v2635_v10 = vld [vmem:[%s3519_s21] ss:$0 sm:$0xff] }
 0x7f1   : > { %v2001_v47 = vmul.f32 %v1997_v58, %v1930_v35  ;;  %v1986_v49 = vmul.f32 %v1982_v42, %v1945_v34  ;;  %v1911_v51 = vmul.f32 0.3275911, %v1907_v20  ;;  %v2015_v11 = vsub.f32 0.0, %v1907_v20 }
 0x7f2   : > { %v1894_v60 = vpop.f32.mrf.mxu2 }
 0x7f3   : > { %v2005_v54 = vadd.f32 0.2548296, %v2001_v47  ;;  %v1990_v46 = vadd.f32 1.4214138, %v1986_v49  ;;  %v1915_v50 = vadd.f32 1.0, %v1911_v51  ;;  %v3382_v59 = vadd.f32 %v3354_v55, %v1894_v60 }
 0x7f4   : > { %v2019_v42 = vmul.f32 %v2015_v11, %v1907_v20 }
 0x7f5   : > { %v2009_v23 = vmul.f32 %v2005_v54, %v1930_v35  ;;  %v1994_v2 = vmul.f32 %v1990_v46, %v1945_v34  ;;  %2724 = vrcp.f32 %v1915_v50  ;;  %v3385_v31 = vmul.f32 0.70710677, %v3382_v59 }
 0x7f6   : > { %2726 = vpow2.f32 %v2023_v61  ;;  %v1958_v44 = vand.u32 2147483648, %v1915_v50  ;;  %v1956_v63 = vand.u32 2147483647, %v1915_v50  ;;  %vm1952_vm11 = vweird.f32 %v1915_v50 }
 0x7f7   : > { %v2029_v4 = vmul.f32 %v2723_v8, %v2009_v23  ;;  %v1998_v27 = vadd.f32 -0.28449672, %v1994_v2  ;;  %v3388_v6 = vand.u32 2147483647, %v3385_v31  ;;  %v2025_v53 = vmul.f32 1.442695, %v2019_v42 }
 0x7f8   : > { %v1959_v24 = vor.u32 1.1754944e-38, %v1958_v44  ;;  %vm1957_vm14 = vcmp.eq.f32.partialorder %v1956_v63, 8.507059e+37  ;;  %vm2040_vm6 = vcmp.ge.f32.partialorder %v3385_v31, 0.0 }
 0x7f9   : > { %v2033_v1 = vsub.f32 1.0, %v2029_v4  ;;  %v2002_v17 = vmul.f32 %v1998_v27, %v1945_v34  ;;  %v1912_v55 = vmul.f32 0.3275911, %v3388_v6  ;;  %v2016_v20 = vsub.f32 0.0, %v3388_v6 }
 0x7fb   : > { %v2725_v37 = vpop.eup %2724  ;;  %v2006_v9 = vadd.f32 0.2548296, %v2002_v17  ;;  %v2041_v14 = vsub.f32 0.0, %v2033_v1  ;;  %v1916_v39 = vadd.f32 1.0, %v1912_v55  ;;  %v2020_v27 = vmul.f32 %v2016_v20, %v3388_v6 }
 0x7fc   : > { %v1948_v12 = vmul.f32 %v2725_v37, %v1915_v50  ;;  %v2727_v15 = vpop.eup %2726  ;;  %vm1953_vm10 = vweird.f32 %v2725_v37 }
 0x7fd   : > { %v2010_v32 = vmul.f32 %v2006_v9, %v1945_v34  ;;  %2728 = vrcp.f32 %v1916_v39  ;;  %v2045_v21 = vsel %vm2037_vm9, %v2033_v1, %v2041_v14  ;;  %vm1954_vm12 = vmor %vm1952_vm11, %vm1953_vm10  ;;  %v1971_v47 = vand.u32 2147483647, %v1916_v39 }
 0x7fe   : > { %v1949_v35 = vsub.f32 1.0, %v1948_v12  ;;  %v2049_v26 = vadd.f32 1.0, %v2045_v21  ;;  %v1973_v43 = vand.u32 2147483648, %v1916_v39  ;;  %vm1967_vm1 = vweird.f32 %v1916_v39 }
 0x7ff   : > { %v2030_v16 = vmul.f32 %v2727_v15, %v2010_v32  ;;  %vm1972_vm4 = vcmp.eq.f32.partialorder %v1971_v47, 8.507059e+37  ;;  %2730 = vpow2.f32 %v2025_v53  ;;  %v2027_v12 = vmul.f32 1.442695, %v2020_v27 }
 0x800   : > { %v1950_v19 = vmul.f32 %v2725_v37, %v1949_v35  ;;  %v2053_v34 = vmul.f32 %v2049_v26, %v1897_v52  ;;  %v1974_v60 = vor.u32 1.1754944e-38, %v1973_v43  ;;  %v1899_v26 = vmul.f32 0.5, %v3375_v7 }
 0x801   : > { %v2034_v5 = vsub.f32 1.0, %v2030_v16  ;;  %2732 = vpow2.f32 %v2027_v12 }
 0x802   : > { %v1951_v0 = vadd.f32 %v2725_v37, %v1950_v19 }
 0x803   : > { %v2042_v13 = vsub.f32 0.0, %v2034_v5  ;;  %v2729_v62 = vpop.eup %2728 }
 0x804   : > { %v1955_v25 = vsel %vm1954_vm12, %v2725_v37, %v1951_v0  ;;  %v1963_v33 = vmul.f32 %v2729_v62, %v1916_v39  ;;  %vm1968_vm0 = vweird.f32 %v2729_v62 }
 0x805   : > { %v2046_v3 = vsel %vm2038_vm13, %v2034_v5, %v2042_v13  ;;  %v1960_v57 = vsel %vm1957_vm14, %v1959_v24, %v1955_v25  ;;  %vm1969_vm3 = vmor %vm1967_vm1, %vm1968_vm0  ;;  %v2731_v55 = vpop.eup %2730  ;;  %v1900_v25 = vmul.f32 0.5, %v3382_v59 }
 0x806   : > { %v2050_v29 = vadd.f32 1.0, %v2046_v3  ;;  %v1979_v30 = vmul.f32 1.0614054, %v1960_v57  ;;  %v1964_v58 = vsub.f32 1.0, %v1963_v33 }
 0x807   : > { %v2733_v63 = vpop.eup %2732 }
 0x808   : > { %v2054_v36 = vmul.f32 %v2050_v29, %v1898_v28  ;;  %v1983_v40 = vadd.f32 -1.4531521, %v1979_v30  ;;  %v1965_v51 = vmul.f32 %v2729_v62, %v1964_v58 }
 0x80a   : > { %v2065_v48 = vpack.c.bf16 %v2054_v36, %v2053_v34  ;;  %v1987_v49 = vmul.f32 %v1983_v40, %v1960_v57  ;;  %v1966_v54 = vadd.f32 %v2729_v62, %v1965_v51 }
 0x80c   : > { %v1991_v56 = vadd.f32 1.4214138, %v1987_v49  ;;  %2523 = vmatmul.msk.bf16.vlgmr.msra.gmra.mxu3 %vm2091_vm15, %v2065_v48  ;;  %v1970_v50 = vsel %vm1969_vm3, %v2729_v62, %v1966_v54 }
 0x80d   : > { %v1975_v23 = vsel %vm1972_vm4, %v1974_v60, %v1970_v50 }
 0x80e   : > { %v1995_v46 = vmul.f32 %v1991_v56, %v1960_v57  ;;  %v1980_v8 = vmul.f32 1.0614054, %v1975_v23 }
 0x810   : > { %v1999_v61 = vadd.f32 -0.28449672, %v1995_v46  ;;  %v1984_v4 = vadd.f32 -1.4531521, %v1980_v8 }
 0x812   : > { %v2003_v2 = vmul.f32 %v1999_v61, %v1960_v57  ;;  %v1988_v17 = vmul.f32 %v1984_v4, %v1975_v23 }
 0x814   : > { %v2007_v1 = vadd.f32 0.2548296, %v2003_v2  ;;  %v1992_v9 = vadd.f32 1.4214138, %v1988_v17 }
 0x816   : > { %v2011_v37 = vmul.f32 %v2007_v1, %v1960_v57  ;;  %v1996_v32 = vmul.f32 %v1992_v9, %v1975_v23 }
 0x818   : > { %v2031_v14 = vmul.f32 %v2731_v55, %v2011_v37  ;;  %v2000_v39 = vadd.f32 -0.28449672, %v1996_v32 }
 0x81a   : > { %v2035_v15 = vsub.f32 1.0, %v2031_v14  ;;  %v2004_v35 = vmul.f32 %v2000_v39, %v1975_v23 }
 0x81c   : > { %v2008_v16 = vadd.f32 0.2548296, %v2004_v35  ;;  %v2043_v44 = vsub.f32 0.0, %v2035_v15 }
 0x81e   : > { %v2012_v19 = vmul.f32 %v2008_v16, %v1975_v23  ;;  %v2047_v6 = vsel %vm2039_vm5, %v2035_v15, %v2043_v44 }
 0x81f   : > { %v2051_v13 = vadd.f32 1.0, %v2047_v6 }
 0x820   : > { %v2032_v21 = vmul.f32 %v2733_v63, %v2012_v19 }
 0x821   : > { %v2055_v52 = vmul.f32 %v2051_v13, %v1899_v26 }
 0x822   : > { %v2036_v5 = vsub.f32 1.0, %v2032_v21 }
 0x824   : > { %v2044_v0 = vsub.f32 0.0, %v2036_v5 }
 0x826   : > { %v2048_v24 = vsel %vm2040_vm6, %v2036_v5, %v2044_v0 }
 0x827   : > { %v2052_v62 = vadd.f32 1.0, %v2048_v24 }
 0x829   : > { %v2056_v3 = vmul.f32 %v2052_v62, %v1900_v25 }
 0x82b   : > { %v2066_v57 = vpack.c.bf16 %v2056_v3, %v2055_v52 }
 0x82d   : > { %2524 = vmatmul.msk.bf16.gmra.mxu3 %vm2091_vm15, %v2066_v57 }
 0x88f   : > { %v2107_v11 = vpop.f32.mrf.mxu3 }
 0x890   : > { %v2117_v28 = vadd.f32 %v2107_v11, %v3293_v18 }
 0x892   : > { %v2125_v31 = vadd.f32 %v2635_v10, %v2117_v28 }
 0x894   : > { %2129 = vst.msk [vmem:[#allocation2] sm:$0xff] %vm859_vm2, %v2125_v31 }
 0x897   : > { %v2109_v7 = vpop.f32.mrf.mxu3 }
 0x898   : > { %v2118_v59 = vadd.f32 %v2109_v7, %v3297_v22 }
 0x89a   : > { %v2126_v29 = vadd.f32 %v2635_v10, %v2118_v59 }
 0x89c   : > { %2130 = vst.msk [vmem:[#allocation2 + $0x8] sm:$0xff] %vm859_vm2, %v2126_v29 }
 0x8b0   : > { %v2112_v30 = vpop.f32.mrf.mxu3 }
 0x8b1   : > { %v2119_v33 = vadd.f32 %v2112_v30, %v3301_v41 }
 0x8b3   : > { %v2127_v34 = vadd.f32 %v2635_v10, %v2119_v33 }
 0x8b5   : > { %2131 = vst.msk [vmem:[#allocation2 + $0x10] sm:$0xff] %vm859_vm2, %v2127_v34 }
 0x8b8   : > { %v2114_v36 = vpop.f32.mrf.mxu3 }
 0x8b9   : > { %v2120_v40 = vadd.f32 %v2114_v36, %v3305_v45  ;;  %2136 = sbr.rel (%p2525_p6) target bundleno = 2516 (0x9d4), region = 100 }
 0x8bb   : > { %v2128_v58 = vadd.f32 %v2635_v10, %v2120_v40 }
 0x8bd   : > { %2132 = vst.msk [vmem:[#allocation2 + $0x18] sm:$0xff] %vm859_vm2, %v2128_v58 }
 0x8be   : > { %v2145_v18 = vsel %vm859_vm2, %v2127_v34, 0.0  ;;  %v2139_v22 = vsel %vm859_vm2, %v2125_v31, 0.0  ;;  %v2148_v41 = vsel %vm859_vm2, %v2128_v58, 0.0  ;;  %v2142_v42 = vsel %vm859_vm2, %v2126_v29, 0.0  ;;  %v2738_v57 = vld [vmem:[%s3520_s26] ss:$0 sm:$0xff] }
 0x8bf   : > { %2146 = vadd.xlane.f32.xlu1 %v2145_v18  ;;  %2140 = vadd.xlane.f32.xlu0 %v2139_v22  ;;  %v2739_v59 = vld [vmem:[%s3521_s20] ss:$0 sm:$0xff] }
 0x8c7   : > { %2149 = vadd.xlane.f32.xlu1 %v2148_v41  ;;  %2143 = vadd.xlane.f32.xlu0 %v2142_v42 }
 0x932   : > { %v2147_v47 = vpop.xlane.xlu1 %2146  ;;  %v2141_v45 = vpop.xlane.xlu0 %2140 }
 0x933   : > { %v2153_v43 = vmul.f32 %v2147_v47, %v3030_v38  ;;  %v2151_v48 = vmul.f32 %v2141_v45, %v3030_v38 }
 0x935   : > { %v3423_v49 = vsub.f32 %v2127_v34, %v2153_v43  ;;  %v2155_v51 = vsub.f32 %v2125_v31, %v2151_v48 }
 0x937   : > { %v2161_v56 = vmul.f32 %v3423_v49, %v3423_v49  ;;  %v2159_v54 = vmul.f32 %v2155_v51, %v2155_v51 }
 0x939   : > { %v2169_v53 = vsel %vm859_vm2, %v2161_v56, 0.0  ;;  %v2163_v60 = vsel %vm859_vm2, %v2159_v54, 0.0 }
 0x93a   : > { %v2150_v46 = vpop.xlane.xlu1 %2149  ;;  %2170 = vadd.xlane.f32.xlu0 %v2169_v53  ;;  %2164 = vadd.xlane.f32.xlu2 %v2163_v60  ;;  %v2144_v50 = vpop.xlane.xlu0 %2143 }
 0x93b   : > { %v2154_v23 = vmul.f32 %v2150_v46, %v3030_v38  ;;  %v2152_v20 = vmul.f32 %v2144_v50, %v3030_v38 }
 0x93d   : > { %v3431_v61 = vsub.f32 %v2128_v58, %v2154_v23  ;;  %v3433_v8 = vsub.f32 %v2126_v29, %v2152_v20 }
 0x93f   : > { %v2162_v2 = vmul.f32 %v3431_v61, %v3431_v61  ;;  %v2160_v4 = vmul.f32 %v3433_v8, %v3433_v8 }
 0x941   : > { %v2172_v27 = vsel %vm859_vm2, %v2162_v2, 0.0  ;;  %v2166_v1 = vsel %vm859_vm2, %v2160_v4, 0.0 }
 0x942   : > { %2173 = vadd.xlane.f32.xlu1 %v2172_v27  ;;  %2167 = vadd.xlane.f32.xlu2 %v2166_v1 }
 0x9ad   : > { %v2165_v17 = vpop.xlane.xlu2 %2164  ;;  %v2171_v37 = vpop.xlane.xlu0 %2170 }
 0x9ae   : > { %v2175_v9 = vmul.f32 %v2165_v17, %v3030_v38  ;;  %v2177_v55 = vmul.f32 %v2171_v37, %v3030_v38 }
 0x9b0   : > { %v2179_v12 = vadd.f32 1e-06, %v2175_v9  ;;  %v2181_v14 = vadd.f32 1e-06, %v2177_v55 }
 0x9b2   : > { %2740 = vrsqrt.f32 %v2179_v12  ;;  %vm2189_vm9 = vweird.f32 %v2179_v12  ;;  %vm2209_vm11 = vweird.f32 %v2181_v14 }
 0x9b3   : > { %2742 = vrsqrt.f32 %v2181_v14 }
 0x9b5   : > { %v2174_v32 = vpop.xlane.xlu1 %2173  ;;  %v2168_v39 = vpop.xlane.xlu2 %2167 }
 0x9b6   : > { %v2178_v15 = vmul.f32 %v2174_v32, %v3030_v38  ;;  %v2176_v35 = vmul.f32 %v2168_v39, %v3030_v38 }
 0x9b8   : > { %v2741_v16 = vpop.eup %2740  ;;  %v2182_v44 = vadd.f32 1e-06, %v2178_v15  ;;  %v2180_v19 = vadd.f32 1e-06, %v2176_v35 }
 0x9b9   : > { %v2743_v63 = vpop.eup %2742  ;;  %v2184_v21 = vmul.f32 %v2741_v16, %v2179_v12  ;;  %vm2190_vm7 = vweird.f32 %v2741_v16 }
 0x9ba   : > { %v2204_v6 = vmul.f32 %v2743_v63, %v2181_v14  ;;  %2744 = vrsqrt.f32 %v2182_v44  ;;  %vm2210_vm8 = vweird.f32 %v2743_v63  ;;  %vm2191_vm10 = vmor %vm2189_vm9, %vm2190_vm7  ;;  %vm2219_vm15 = vweird.f32 %v2182_v44 }
 0x9bb   : > { %v2185_v5 = vmul.f32 %v2741_v16, %v2184_v21  ;;  %2746 = vrsqrt.f32 %v2180_v19  ;;  %vm2211_vm12 = vmor %vm2209_vm11, %vm2210_vm8  ;;  %vm2199_vm1 = vweird.f32 %v2180_v19 }
 0x9bc   : > { %v2205_v0 = vmul.f32 %v2743_v63, %v2204_v6 }
 0x9bd   : > { %v2186_v13 = vmul.f32 0.5, %v2185_v5 }
 0x9be   : > { %v2206_v24 = vmul.f32 0.5, %v2205_v0 }
 0x9bf   : > { %v2187_v26 = vsub.f32 1.5, %v2186_v13 }
 0x9c0   : > { %v2745_v25 = vpop.eup %2744  ;;  %v2207_v62 = vsub.f32 1.5, %v2206_v24 }
 0x9c1   : > { %v2747_v52 = vpop.eup %2746  ;;  %v2188_v3 = vmul.f32 %v2741_v16, %v2187_v26  ;;  %v2214_v38 = vmul.f32 %v2745_v25, %v2182_v44  ;;  %vm2220_vm13 = vweird.f32 %v2745_v25 }
 0x9c2   : > { %v2208_v10 = vmul.f32 %v2743_v63, %v2207_v62  ;;  %v2194_v11 = vmul.f32 %v2747_v52, %v2180_v19  ;;  %vm2200_vm14 = vweird.f32 %v2747_v52  ;;  %vm2221_vm0 = vmor %vm2219_vm15, %vm2220_vm13 }
 0x9c3   : > { %v2192_v28 = vsel %vm2191_vm10, %v2741_v16, %v2188_v3  ;;  %v2215_v31 = vmul.f32 %v2745_v25, %v2214_v38  ;;  %vm2201_vm3 = vmor %vm2199_vm1, %vm2200_vm14 }
 0x9c4   : > { %v2223_v7 = vmul.f32 %v2192_v28, %v2155_v51  ;;  %v2212_v29 = vsel %vm2211_vm12, %v2743_v63, %v2208_v10  ;;  %v2195_v30 = vmul.f32 %v2747_v52, %v2194_v11 }
 0x9c5   : > { %v2225_v33 = vmul.f32 %v2212_v29, %v3423_v49  ;;  %v2216_v34 = vmul.f32 0.5, %v2215_v31 }
 0x9c6   : > { %v2230_v36 = vmul.f32 %v2738_v57, %v2223_v7  ;;  %v2196_v40 = vmul.f32 0.5, %v2195_v30 }
 0x9c7   : > { %v2232_v58 = vmul.f32 %v2738_v57, %v2225_v33  ;;  %v2217_v18 = vsub.f32 1.5, %v2216_v34 }
 0x9c8   : > { %v2237_v22 = vadd.f32 %v2739_v59, %v2230_v36  ;;  %v2197_v41 = vsub.f32 1.5, %v2196_v40 }
 0x9c9   : > { %v2239_v42 = vadd.f32 %v2739_v59, %v2232_v58  ;;  %v2218_v47 = vmul.f32 %v2745_v25, %v2217_v18 }
 0x9ca   : > { %2241 = vst.msk [vmem:[#allocation3] sm:$0xff] %vm859_vm2, %v2237_v22  ;;  %v2198_v45 = vmul.f32 %v2747_v52, %v2197_v41 }
 0x9cb   : > { %2243 = vst.msk [vmem:[#allocation3 + $0x10] sm:$0xff] %vm859_vm2, %v2239_v42  ;;  %v2222_v43 = vsel %vm2221_vm0, %v2745_v25, %v2218_v47 }
 0x9cc   : > { %v2226_v48 = vmul.f32 %v2222_v43, %v3431_v61  ;;  %v2202_v49 = vsel %vm2201_vm3, %v2747_v52, %v2198_v45 }
 0x9cd   : > { %v2224_v51 = vmul.f32 %v2202_v49, %v3433_v8 }
 0x9ce   : > { %v2233_v56 = vmul.f32 %v2738_v57, %v2226_v48 }
 0x9cf   : > { %v2231_v54 = vmul.f32 %v2738_v57, %v2224_v51 }
 0x9d0   : > { %v2240_v53 = vadd.f32 %v2739_v59, %v2233_v56 }
 0x9d1   : > { %v2238_v60 = vadd.f32 %v2739_v59, %v2231_v54 }
 0x9d2   : > { %2244 = vst.msk [vmem:[#allocation3 + $0x18] sm:$0xff] %vm859_vm2, %v2240_v53 }
 0x9d3   : > { %2242 = vst.msk [vmem:[#allocation3 + $0x8] sm:$0xff] %vm859_vm2, %v2238_v60 }
 0x9d4 PF: > { %s3522_s18 = sld [smem:[#allocation7_spill]]  ;;  %s2819_s16 = smov [#allocation3]  }
 0x9d5   : > { %s3524_s17 = sld [smem:[#allocation17_spill]]  ;;  %s2254_s30 = sshll.u32 %s2819_s16, 4  ;;  %s2255_s30 = int_to_ptr.vmem [resolvable:$true] %s2254_s30 }
 0x9d6   : > { %s2820_s8 = smov 128  }
 0x9da   : > { %s3523_s28 = sadd.s32 4294967295, %s3522_s18  }
 0x9db   : > { %p2554_p7 = scmp.eq.s32.totalorder %s3523_s28, 1  ;;  %s2256_s25 = sshll.u32 %s3524_s17, 4  ;;  %s2257_s25 = int_to_ptr.hbm [resolvable:$true] %s2256_s25 }
 0x9dd   : > { %2551 = dma.vmem_to_hbm [thread:$0]  (%p2554_p7), %s2255_s30, 512, %s2257_s25, [#allocation4], %s2820_s8, %s2820_s8, %s2816_s2  }
 0x9de   : > { %2789 = dma.done.wait (%p2554_p7), [#allocation4], 512  }
 0x9df   : > { %2791 = vsyncadd (%p2554_p7), [#allocation4], 4294966784 }
 0x9e0 PF: > { %s3525_s22 = sld [smem:[#allocation7_spill]] }
 0x9e1   : > { %s3526_s27 = sld [smem:[#allocation6_spill]] }
 0x9e2   : > { %s3527_s28 = sld [smem:[#allocation8_spill]] }
 0x9e6   : > { %s29_s29 = sadd.s32 1, %s3525_s22  }
 0x9e7   : > { %p26_p8 = scmp.ge.s32.totalorder %s29_s29, 4  }
 0x9e9   :  { %28 = sbr.rel (!%p26_p8) target bundleno = 11 (0xb), region = 164 }
 0x9ee   :  { %2273 = vsyncpa [#allocation4], 1 }
 0x9ef   :  { %2275 = vsyncpa [#allocation4 + $0x1], 1 }

</bundles_post_ra>
